<compile_context>
chip_gen: v7x
topology: tpu7x:2x2x1
jax: 0.10.0
libtpu: 0.0.40
codegen_flags: <defaults>
</compile_context>

<pallas_src>
import functools
import math

import jax
import jax.numpy as jnp
from jax.experimental import pallas as pl
from jax.experimental.pallas import tpu as pltpu


# ---------------------------------------------------------------------------
# In-kernel helpers
# ---------------------------------------------------------------------------
def _erf(x):
    # Abramowitz & Stegun 7.1.26 (max abs error ~1.5e-7, i.e. f32-exact).  Uses only
    # exp / mul / add / where, all of which have guaranteed Mosaic lowerings.
    a1, a2, a3, a4, a5 = 0.254829592, -0.284496736, 1.421413741, -1.453152027, 1.061405429
    p = 0.3275911
    z = jnp.abs(x)
    t = 1.0 / (1.0 + p * z)
    poly = ((((a5 * t + a4) * t + a3) * t + a2) * t + a1) * t
    e = 1.0 - poly * jnp.exp(-z * z)
    return jnp.where(x >= 0.0, e, -e)


def _gelu_exact(x):
    # torch.nn.functional.gelu default (erf form), not the tanh approximation.
    return 0.5 * x * (1.0 + _erf(x * (1.0 / math.sqrt(2.0))))


def _shift_lanes(h, s):
    """out[:, p] = h[:, p + s], zero-filled outside [0, L).  Static shift -> concat of slices."""
    if s == 0:
        return h
    rows, L = h.shape
    z = jnp.zeros((rows, abs(s)), h.dtype)
    if s > 0:
        return jnp.concatenate([h[:, s:], z], axis=1)
    return jnp.concatenate([z, h[:, : L + s]], axis=1)


# ---------------------------------------------------------------------------
# Fused FeedForward kernel (one grid step == one image of the batch)
# ---------------------------------------------------------------------------
def _ffn_kernel(x_ref, w_in_ref, b_in_ref, w_dw_ref, b_dw_ref, w_out_ref, b_out_ref,
                o_ref, *, H, W, hidden):
    x = x_ref[0]                                                   # (C, HWp), lane-dense

    # ---- project_in: 1x1 conv == (2*hidden, C) @ (C, HWp) on the MXU ----
    h = jnp.dot(w_in_ref[...], x, preferred_element_type=jnp.float32) + b_in_ref[...]

    # ---- 3x3 depthwise conv (padding=1) as 9 shifted VPU multiply-adds ----
    HWp = h.shape[1]
    wdw = w_dw_ref[...]                                            # (2*hidden, 9)
    lane = jax.lax.broadcasted_iota(jnp.int32, (1, HWp), 1)
    if (W & (W - 1)) == 0:                                         # power-of-two fast path
        py = lane >> (W.bit_length() - 1)
        px = lane & (W - 1)
    else:
        py = lane // W
        px = lane - py * W

    acc = jnp.zeros_like(h)
    for ky in range(3):
        for kx in range(3):
            dy, dx = ky - 1, kx - 1
            s = dy * W + dx
            tap = _shift_lanes(h, s)
            valid = ((py + dy >= 0) & (py + dy < H) &
                     (px + dx >= 0) & (px + dx < W))
            tap = jnp.where(valid, tap, 0.0)
            acc = acc + wdw[:, ky * 3 + kx:ky * 3 + kx + 1] * tap
    d = acc + b_dw_ref[...]

    # ---- gating: gelu(x1) * x2  (chunk along the channel/sublane axis) ----
    g = _gelu_exact(d[:hidden]) * d[hidden:]

    # ---- project_out: 1x1 conv == (C, hidden) @ (hidden, HWp) on the MXU ----
    y = jnp.dot(w_out_ref[...], g, preferred_element_type=jnp.float32) + b_out_ref[...]
    o_ref[0] = y


def feed_forward_pallas(x, params):
    """FeedForward forward pass.  x: (B, dim, H, W) f32, params in PyTorch conv layout."""
    B, C, H, W = x.shape
    C2 = params["w_in"].shape[0]
    hidden = C2 // 2
    HW = H * W
    HWp = ((HW + 127) // 128) * 128                                # lane-dense spatial axis

    # Per-step VMEM working set estimate (f32): x/out blocks + ~4 intermediates of (C2, HWp).
    vmem_est = 4 * HWp * (2 * C + 6 * C2)
    if vmem_est > 40 * 1024 * 1024:                                # keep headroom for v7x's 64 MiB VMEM
        # TODO(synk): for large H*W, tile the spatial axis over a second grid dim with a
        # one-row halo instead of processing a whole image per grid step.
        raise NotImplementedError("image too large for the single-tile fused FFN kernel")

    xf = x.reshape(B, C, HW).astype(jnp.float32)
    if HWp != HW:
        xf = jnp.pad(xf, ((0, 0), (0, 0), (0, HWp - HW)))

    w_in = params["w_in"].reshape(C2, C).astype(jnp.float32)
    b_in = params["b_in"].reshape(C2, 1).astype(jnp.float32)
    w_dw = params["w_dw"].reshape(C2, 9).astype(jnp.float32)
    b_dw = params["b_dw"].reshape(C2, 1).astype(jnp.float32)
    w_out = params["w_out"].reshape(C, hidden).astype(jnp.float32)
    b_out = params["b_out"].reshape(C, 1).astype(jnp.float32)

    out = pl.pallas_call(
        functools.partial(_ffn_kernel, H=H, W=W, hidden=hidden),
        grid=(B,),
        in_specs=[
            pl.BlockSpec((1, C, HWp), lambda b: (b, 0, 0)),        # x block: (C, HWp)
            pl.BlockSpec((C2, C), lambda b: (0, 0)),               # project_in weight
            pl.BlockSpec((C2, 1), lambda b: (0, 0)),               # project_in bias
            pl.BlockSpec((C2, 9), lambda b: (0, 0)),               # depthwise weight
            pl.BlockSpec((C2, 1), lambda b: (0, 0)),               # depthwise bias
            pl.BlockSpec((C, hidden), lambda b: (0, 0)),           # project_out weight
            pl.BlockSpec((C, 1), lambda b: (0, 0)),                # project_out bias
        ],
        out_specs=pl.BlockSpec((1, C, HWp), lambda b: (b, 0, 0)),
        out_shape=jax.ShapeDtypeStruct((B, C, HWp), jnp.float32),
        compiler_params=pltpu.CompilerParams(
            dimension_semantics=("parallel",)),                    # shard batch across TCs (v7x)
    )(xf, w_in, b_in, w_dw, b_dw, w_out, b_out)

    return out[:, :, :HW].reshape(B, C, H, W)


# ---------------------------------------------------------------------------
# Pure-JAX reference (ground truth for the correctness check)
# ---------------------------------------------------------------------------
def feed_forward_reference(x, params):
    dn = ("NCHW", "OIHW", "NCHW")
    hp = jax.lax.Precision.HIGHEST
    C2 = params["w_in"].shape[0]
    hidden = C2 // 2
    h = jax.lax.conv_general_dilated(x, params["w_in"], (1, 1), "VALID",
                                     dimension_numbers=dn, precision=hp)
    h = h + params["b_in"][None, :, None, None]
    d = jax.lax.conv_general_dilated(h, params["w_dw"], (1, 1), ((1, 1), (1, 1)),
                                     dimension_numbers=dn, feature_group_count=C2,
                                     precision=hp)
    d = d + params["b_dw"][None, :, None, None]
    x1, x2 = d[:, :hidden], d[:, hidden:]
    g = jax.nn.gelu(x1, approximate=False) * x2
    y = jax.lax.conv_general_dilated(g, params["w_out"], (1, 1), "VALID",
                                     dimension_numbers=dn, precision=hp)
    return y + params["b_out"][None, :, None, None]


# ---------------------------------------------------------------------------
if __name__ == "__main__":
    dim, ffn_expansion_factor, bias = 8, 2, True
    hidden = int(dim * ffn_expansion_factor)
    B, H, W = 2, 16, 16

    ks = jax.random.split(jax.random.PRNGKey(0), 7)
    params = {
        "w_in": 0.15 * jax.random.normal(ks[0], (2 * hidden, dim, 1, 1), jnp.float32),
        "b_in": (0.05 * jax.random.normal(ks[1], (2 * hidden,), jnp.float32)
                 if bias else jnp.zeros((2 * hidden,), jnp.float32)),
        "w_dw": 0.15 * jax.random.normal(ks[2], (2 * hidden, 1, 3, 3), jnp.float32),
        "b_dw": (0.05 * jax.random.normal(ks[3], (2 * hidden,), jnp.float32)
                 if bias else jnp.zeros((2 * hidden,), jnp.float32)),
        "w_out": 0.15 * jax.random.normal(ks[4], (dim, hidden, 1, 1), jnp.float32),
        "b_out": (0.05 * jax.random.normal(ks[5], (dim,), jnp.float32)
                  if bias else jnp.zeros((dim,), jnp.float32)),
    }
    x = jax.random.uniform(ks[6], (B, dim, H, W), jnp.float32)

    fwd = jax.jit(feed_forward_pallas)
    out = fwd(x, params)
    jax.block_until_ready(out)

    ref = feed_forward_reference(x, params)
    max_err = float(jnp.max(jnp.abs(out - ref)))

    assert out.shape == (B, dim, H, W)
    assert bool(jnp.all(jnp.isfinite(out)))
    assert max_err < 2e-3, f"max abs error vs reference: {max_err}"
    print("KERNEL_OK")
</pallas_src>

<mosaic_0001>
module attributes {stable_mosaic.version = 11 : i64} {
  func.func @_ffn_kernel(%arg0: i32, %arg1: memref<1x8x256xf32, #tpu.memory_space<vmem>>, %arg2: memref<32x8xf32, #tpu.memory_space<vmem>>, %arg3: memref<32x1xf32, #tpu.memory_space<vmem>>, %arg4: memref<32x9xf32, #tpu.memory_space<vmem>>, %arg5: memref<32x1xf32, #tpu.memory_space<vmem>>, %arg6: memref<8x16xf32, #tpu.memory_space<vmem>>, %arg7: memref<8x1xf32, #tpu.memory_space<vmem>>, %arg8: memref<1x8x256xf32, #tpu.memory_space<vmem>>) attributes {dimension_semantics = [#tpu.dimension_semantics<parallel>], iteration_bounds = array<i64: 2>, scalar_prefetch = 0 : i64, scratch_operands = 0 : i64, tpu.core_type = #tpu.core_type<tc>, window_params = [{transform_indices = @transform_0, window_bounds = array<i64: 1, 8, 256>}, {pipeline_mode = #tpu.pipeline_mode<synchronous>, transform_indices = @transform_1, window_bounds = array<i64: 32, 8>}, {pipeline_mode = #tpu.pipeline_mode<synchronous>, transform_indices = @transform_2, window_bounds = array<i64: 32, 1>}, {pipeline_mode = #tpu.pipeline_mode<synchronous>, transform_indices = @transform_3, window_bounds = array<i64: 32, 9>}, {pipeline_mode = #tpu.pipeline_mode<synchronous>, transform_indices = @transform_4, window_bounds = array<i64: 32, 1>}, {pipeline_mode = #tpu.pipeline_mode<synchronous>, transform_indices = @transform_5, window_bounds = array<i64: 8, 16>}, {pipeline_mode = #tpu.pipeline_mode<synchronous>, transform_indices = @transform_6, window_bounds = array<i64: 8, 1>}, {transform_indices = @transform_7, window_bounds = array<i64: 1, 8, 256>}]} {
    %c0 = arith.constant 0 : index
    %c0_0 = arith.constant 0 : index
    %c0_1 = arith.constant 0 : index
    %0 = vector.load %arg1[%c0, %c0_0, %c0_1] : memref<1x8x256xf32, #tpu.memory_space<vmem>>, vector<1x8x256xf32>
    %1 = vector.shape_cast %0 : vector<1x8x256xf32> to vector<8x256xf32>
    %c0_2 = arith.constant 0 : index
    %c0_3 = arith.constant 0 : index
    %2 = vector.load %arg2[%c0_2, %c0_3] : memref<32x8xf32, #tpu.memory_space<vmem>>, vector<32x8xf32>
    %cst = arith.constant dense<0.000000e+00> : vector<32x256xf32>
    %3 = tpu.matmul %2, %1, %cst {dimension_numbers = #tpu.dot_dimension_numbers<[1], [0], [0], [1], [0, 0, 1, 1], [], []>} : vector<32x8xf32>, vector<8x256xf32>, vector<32x256xf32> -> vector<32x256xf32>
    %c0_4 = arith.constant 0 : index
    %c0_5 = arith.constant 0 : index
    %4 = vector.load %arg3[%c0_4, %c0_5] : memref<32x1xf32, #tpu.memory_space<vmem>>, vector<32x1xf32>
    %5 = vector.broadcast %4 : vector<32x1xf32> to vector<32x256xf32>
    %6 = arith.addf %3, %5 : vector<32x256xf32>
    %c0_6 = arith.constant 0 : index
    %c0_7 = arith.constant 0 : index
    %7 = vector.load %arg4[%c0_6, %c0_7] : memref<32x9xf32, #tpu.memory_space<vmem>>, vector<32x9xf32>
    %8 = tpu.iota {dimensions = array<i32: 1>} : vector<1x256xi32>
    %c4_i32 = arith.constant 4 : i32
    %9 = vector.broadcast %c4_i32 : i32 to vector<1x256xi32>
    %10 = arith.shrsi %8, %9 : vector<1x256xi32>
    %c15_i32 = arith.constant 15 : i32
    %11 = vector.broadcast %c15_i32 : i32 to vector<1x256xi32>
    %12 = arith.andi %8, %11 : vector<1x256xi32>
    %cst_8 = arith.constant 0.000000e+00 : f32
    %13 = vector.broadcast %cst_8 : f32 to vector<32x256xf32>
    %cst_9 = arith.constant 0.000000e+00 : f32
    %14 = vector.broadcast %cst_9 : f32 to vector<32x17xf32>
    %15 = vector.extract_strided_slice %6 {offsets = [0, 0], sizes = [32, 239], strides = [1, 1]} : vector<32x256xf32> to vector<32x239xf32>
    %16 = tpu.concatenate %14, %15 in 1 : vector<32x17xf32>, vector<32x239xf32> -> vector<32x256xf32>
    %c-1_i32 = arith.constant -1 : i32
    %17 = vector.broadcast %c-1_i32 : i32 to vector<1x256xi32>
    %18 = arith.addi %10, %17 : vector<1x256xi32>
    %c0_i32 = arith.constant 0 : i32
    %19 = vector.broadcast %c0_i32 : i32 to vector<1x256xi32>
    %20 = arith.cmpi sge, %18, %19 : vector<1x256xi32>
    %c-1_i32_10 = arith.constant -1 : i32
    %21 = vector.broadcast %c-1_i32_10 : i32 to vector<1x256xi32>
    %22 = arith.addi %10, %21 : vector<1x256xi32>
    %c16_i32 = arith.constant 16 : i32
    %23 = vector.broadcast %c16_i32 : i32 to vector<1x256xi32>
    %24 = arith.cmpi slt, %22, %23 : vector<1x256xi32>
    %25 = arith.andi %20, %24 : vector<1x256xi1>
    %c-1_i32_11 = arith.constant -1 : i32
    %26 = vector.broadcast %c-1_i32_11 : i32 to vector<1x256xi32>
    %27 = arith.addi %12, %26 : vector<1x256xi32>
    %c0_i32_12 = arith.constant 0 : i32
    %28 = vector.broadcast %c0_i32_12 : i32 to vector<1x256xi32>
    %29 = arith.cmpi sge, %27, %28 : vector<1x256xi32>
    %30 = arith.andi %25, %29 : vector<1x256xi1>
    %c-1_i32_13 = arith.constant -1 : i32
    %31 = vector.broadcast %c-1_i32_13 : i32 to vector<1x256xi32>
    %32 = arith.addi %12, %31 : vector<1x256xi32>
    %c16_i32_14 = arith.constant 16 : i32
    %33 = vector.broadcast %c16_i32_14 : i32 to vector<1x256xi32>
    %34 = arith.cmpi slt, %32, %33 : vector<1x256xi32>
    %35 = arith.andi %30, %34 : vector<1x256xi1>
    %cst_15 = arith.constant 0.000000e+00 : f32
    %36 = vector.shape_cast %35 : vector<1x256xi1> to vector<1x256xi1>
    %37 = vector.broadcast %36 : vector<1x256xi1> to vector<32x256xi1>
    %38 = vector.broadcast %cst_15 : f32 to vector<32x256xf32>
    %39 = arith.select %37, %16, %38 : vector<32x256xi1>, vector<32x256xf32>
    %40 = vector.extract_strided_slice %7 {offsets = [0, 0], sizes = [32, 1], strides = [1, 1]} : vector<32x9xf32> to vector<32x1xf32>
    %41 = vector.broadcast %40 : vector<32x1xf32> to vector<32x256xf32>
    %42 = arith.mulf %41, %39 : vector<32x256xf32>
    %43 = arith.addf %13, %42 : vector<32x256xf32>
    %cst_16 = arith.constant 0.000000e+00 : f32
    %44 = vector.broadcast %cst_16 : f32 to vector<32x16xf32>
    %45 = vector.extract_strided_slice %6 {offsets = [0, 0], sizes = [32, 240], strides = [1, 1]} : vector<32x256xf32> to vector<32x240xf32>
    %46 = tpu.concatenate %44, %45 in 1 : vector<32x16xf32>, vector<32x240xf32> -> vector<32x256xf32>
    %c-1_i32_17 = arith.constant -1 : i32
    %47 = vector.broadcast %c-1_i32_17 : i32 to vector<1x256xi32>
    %48 = arith.addi %10, %47 : vector<1x256xi32>
    %c0_i32_18 = arith.constant 0 : i32
    %49 = vector.broadcast %c0_i32_18 : i32 to vector<1x256xi32>
    %50 = arith.cmpi sge, %48, %49 : vector<1x256xi32>
    %c-1_i32_19 = arith.constant -1 : i32
    %51 = vector.broadcast %c-1_i32_19 : i32 to vector<1x256xi32>
    %52 = arith.addi %10, %51 : vector<1x256xi32>
    %c16_i32_20 = arith.constant 16 : i32
    %53 = vector.broadcast %c16_i32_20 : i32 to vector<1x256xi32>
    %54 = arith.cmpi slt, %52, %53 : vector<1x256xi32>
    %55 = arith.andi %50, %54 : vector<1x256xi1>
    %c0_i32_21 = arith.constant 0 : i32
    %56 = vector.broadcast %c0_i32_21 : i32 to vector<1x256xi32>
    %57 = arith.addi %12, %56 : vector<1x256xi32>
    %c0_i32_22 = arith.constant 0 : i32
    %58 = vector.broadcast %c0_i32_22 : i32 to vector<1x256xi32>
    %59 = arith.cmpi sge, %57, %58 : vector<1x256xi32>
    %60 = arith.andi %55, %59 : vector<1x256xi1>
    %c0_i32_23 = arith.constant 0 : i32
    %61 = vector.broadcast %c0_i32_23 : i32 to vector<1x256xi32>
    %62 = arith.addi %12, %61 : vector<1x256xi32>
    %c16_i32_24 = arith.constant 16 : i32
    %63 = vector.broadcast %c16_i32_24 : i32 to vector<1x256xi32>
    %64 = arith.cmpi slt, %62, %63 : vector<1x256xi32>
    %65 = arith.andi %60, %64 : vector<1x256xi1>
    %cst_25 = arith.constant 0.000000e+00 : f32
    %66 = vector.shape_cast %65 : vector<1x256xi1> to vector<1x256xi1>
    %67 = vector.broadcast %66 : vector<1x256xi1> to vector<32x256xi1>
    %68 = vector.broadcast %cst_25 : f32 to vector<32x256xf32>
    %69 = arith.select %67, %46, %68 : vector<32x256xi1>, vector<32x256xf32>
    %70 = vector.extract_strided_slice %7 {offsets = [0, 1], sizes = [32, 1], strides = [1, 1]} : vector<32x9xf32> to vector<32x1xf32>
    %71 = vector.broadcast %70 : vector<32x1xf32> to vector<32x256xf32>
    %72 = arith.mulf %71, %69 : vector<32x256xf32>
    %73 = arith.addf %43, %72 : vector<32x256xf32>
    %cst_26 = arith.constant 0.000000e+00 : f32
    %74 = vector.broadcast %cst_26 : f32 to vector<32x15xf32>
    %75 = vector.extract_strided_slice %6 {offsets = [0, 0], sizes = [32, 241], strides = [1, 1]} : vector<32x256xf32> to vector<32x241xf32>
    %76 = tpu.concatenate %74, %75 in 1 : vector<32x15xf32>, vector<32x241xf32> -> vector<32x256xf32>
    %c-1_i32_27 = arith.constant -1 : i32
    %77 = vector.broadcast %c-1_i32_27 : i32 to vector<1x256xi32>
    %78 = arith.addi %10, %77 : vector<1x256xi32>
    %c0_i32_28 = arith.constant 0 : i32
    %79 = vector.broadcast %c0_i32_28 : i32 to vector<1x256xi32>
    %80 = arith.cmpi sge, %78, %79 : vector<1x256xi32>
    %c-1_i32_29 = arith.constant -1 : i32
    %81 = vector.broadcast %c-1_i32_29 : i32 to vector<1x256xi32>
    %82 = arith.addi %10, %81 : vector<1x256xi32>
    %c16_i32_30 = arith.constant 16 : i32
    %83 = vector.broadcast %c16_i32_30 : i32 to vector<1x256xi32>
    %84 = arith.cmpi slt, %82, %83 : vector<1x256xi32>
    %85 = arith.andi %80, %84 : vector<1x256xi1>
    %c1_i32 = arith.constant 1 : i32
    %86 = vector.broadcast %c1_i32 : i32 to vector<1x256xi32>
    %87 = arith.addi %12, %86 : vector<1x256xi32>
    %c0_i32_31 = arith.constant 0 : i32
    %88 = vector.broadcast %c0_i32_31 : i32 to vector<1x256xi32>
    %89 = arith.cmpi sge, %87, %88 : vector<1x256xi32>
    %90 = arith.andi %85, %89 : vector<1x256xi1>
    %c1_i32_32 = arith.constant 1 : i32
    %91 = vector.broadcast %c1_i32_32 : i32 to vector<1x256xi32>
    %92 = arith.addi %12, %91 : vector<1x256xi32>
    %c16_i32_33 = arith.constant 16 : i32
    %93 = vector.broadcast %c16_i32_33 : i32 to vector<1x256xi32>
    %94 = arith.cmpi slt, %92, %93 : vector<1x256xi32>
    %95 = arith.andi %90, %94 : vector<1x256xi1>
    %cst_34 = arith.constant 0.000000e+00 : f32
    %96 = vector.shape_cast %95 : vector<1x256xi1> to vector<1x256xi1>
    %97 = vector.broadcast %96 : vector<1x256xi1> to vector<32x256xi1>
    %98 = vector.broadcast %cst_34 : f32 to vector<32x256xf32>
    %99 = arith.select %97, %76, %98 : vector<32x256xi1>, vector<32x256xf32>
    %100 = vector.extract_strided_slice %7 {offsets = [0, 2], sizes = [32, 1], strides = [1, 1]} : vector<32x9xf32> to vector<32x1xf32>
    %101 = vector.broadcast %100 : vector<32x1xf32> to vector<32x256xf32>
    %102 = arith.mulf %101, %99 : vector<32x256xf32>
    %103 = arith.addf %73, %102 : vector<32x256xf32>
    %cst_35 = arith.constant 0.000000e+00 : f32
    %104 = vector.broadcast %cst_35 : f32 to vector<32x1xf32>
    %105 = vector.extract_strided_slice %6 {offsets = [0, 0], sizes = [32, 255], strides = [1, 1]} : vector<32x256xf32> to vector<32x255xf32>
    %106 = tpu.concatenate %104, %105 in 1 : vector<32x1xf32>, vector<32x255xf32> -> vector<32x256xf32>
    %c0_i32_36 = arith.constant 0 : i32
    %107 = vector.broadcast %c0_i32_36 : i32 to vector<1x256xi32>
    %108 = arith.addi %10, %107 : vector<1x256xi32>
    %c0_i32_37 = arith.constant 0 : i32
    %109 = vector.broadcast %c0_i32_37 : i32 to vector<1x256xi32>
    %110 = arith.cmpi sge, %108, %109 : vector<1x256xi32>
    %c0_i32_38 = arith.constant 0 : i32
    %111 = vector.broadcast %c0_i32_38 : i32 to vector<1x256xi32>
    %112 = arith.addi %10, %111 : vector<1x256xi32>
    %c16_i32_39 = arith.constant 16 : i32
    %113 = vector.broadcast %c16_i32_39 : i32 to vector<1x256xi32>
    %114 = arith.cmpi slt, %112, %113 : vector<1x256xi32>
    %115 = arith.andi %110, %114 : vector<1x256xi1>
    %c-1_i32_40 = arith.constant -1 : i32
    %116 = vector.broadcast %c-1_i32_40 : i32 to vector<1x256xi32>
    %117 = arith.addi %12, %116 : vector<1x256xi32>
    %c0_i32_41 = arith.constant 0 : i32
    %118 = vector.broadcast %c0_i32_41 : i32 to vector<1x256xi32>
    %119 = arith.cmpi sge, %117, %118 : vector<1x256xi32>
    %120 = arith.andi %115, %119 : vector<1x256xi1>
    %c-1_i32_42 = arith.constant -1 : i32
    %121 = vector.broadcast %c-1_i32_42 : i32 to vector<1x256xi32>
    %122 = arith.addi %12, %121 : vector<1x256xi32>
    %c16_i32_43 = arith.constant 16 : i32
    %123 = vector.broadcast %c16_i32_43 : i32 to vector<1x256xi32>
    %124 = arith.cmpi slt, %122, %123 : vector<1x256xi32>
    %125 = arith.andi %120, %124 : vector<1x256xi1>
    %cst_44 = arith.constant 0.000000e+00 : f32
    %126 = vector.shape_cast %125 : vector<1x256xi1> to vector<1x256xi1>
    %127 = vector.broadcast %126 : vector<1x256xi1> to vector<32x256xi1>
    %128 = vector.broadcast %cst_44 : f32 to vector<32x256xf32>
    %129 = arith.select %127, %106, %128 : vector<32x256xi1>, vector<32x256xf32>
    %130 = vector.extract_strided_slice %7 {offsets = [0, 3], sizes = [32, 1], strides = [1, 1]} : vector<32x9xf32> to vector<32x1xf32>
    %131 = vector.broadcast %130 : vector<32x1xf32> to vector<32x256xf32>
    %132 = arith.mulf %131, %129 : vector<32x256xf32>
    %133 = arith.addf %103, %132 : vector<32x256xf32>
    %c0_i32_45 = arith.constant 0 : i32
    %134 = vector.broadcast %c0_i32_45 : i32 to vector<1x256xi32>
    %135 = arith.addi %10, %134 : vector<1x256xi32>
    %c0_i32_46 = arith.constant 0 : i32
    %136 = vector.broadcast %c0_i32_46 : i32 to vector<1x256xi32>
    %137 = arith.cmpi sge, %135, %136 : vector<1x256xi32>
    %c0_i32_47 = arith.constant 0 : i32
    %138 = vector.broadcast %c0_i32_47 : i32 to vector<1x256xi32>
    %139 = arith.addi %10, %138 : vector<1x256xi32>
    %c16_i32_48 = arith.constant 16 : i32
    %140 = vector.broadcast %c16_i32_48 : i32 to vector<1x256xi32>
    %141 = arith.cmpi slt, %139, %140 : vector<1x256xi32>
    %142 = arith.andi %137, %141 : vector<1x256xi1>
    %c0_i32_49 = arith.constant 0 : i32
    %143 = vector.broadcast %c0_i32_49 : i32 to vector<1x256xi32>
    %144 = arith.addi %12, %143 : vector<1x256xi32>
    %c0_i32_50 = arith.constant 0 : i32
    %145 = vector.broadcast %c0_i32_50 : i32 to vector<1x256xi32>
    %146 = arith.cmpi sge, %144, %145 : vector<1x256xi32>
    %147 = arith.andi %142, %146 : vector<1x256xi1>
    %c0_i32_51 = arith.constant 0 : i32
    %148 = vector.broadcast %c0_i32_51 : i32 to vector<1x256xi32>
    %149 = arith.addi %12, %148 : vector<1x256xi32>
    %c16_i32_52 = arith.constant 16 : i32
    %150 = vector.broadcast %c16_i32_52 : i32 to vector<1x256xi32>
    %151 = arith.cmpi slt, %149, %150 : vector<1x256xi32>
    %152 = arith.andi %147, %151 : vector<1x256xi1>
    %cst_53 = arith.constant 0.000000e+00 : f32
    %153 = vector.shape_cast %152 : vector<1x256xi1> to vector<1x256xi1>
    %154 = vector.broadcast %153 : vector<1x256xi1> to vector<32x256xi1>
    %155 = vector.broadcast %cst_53 : f32 to vector<32x256xf32>
    %156 = arith.select %154, %6, %155 : vector<32x256xi1>, vector<32x256xf32>
    %157 = vector.extract_strided_slice %7 {offsets = [0, 4], sizes = [32, 1], strides = [1, 1]} : vector<32x9xf32> to vector<32x1xf32>
    %158 = vector.broadcast %157 : vector<32x1xf32> to vector<32x256xf32>
    %159 = arith.mulf %158, %156 : vector<32x256xf32>
    %160 = arith.addf %133, %159 : vector<32x256xf32>
    %cst_54 = arith.constant 0.000000e+00 : f32
    %161 = vector.broadcast %cst_54 : f32 to vector<32x1xf32>
    %162 = vector.extract_strided_slice %6 {offsets = [0, 1], sizes = [32, 255], strides = [1, 1]} : vector<32x256xf32> to vector<32x255xf32>
    %163 = tpu.concatenate %162, %161 in 1 : vector<32x255xf32>, vector<32x1xf32> -> vector<32x256xf32>
    %c0_i32_55 = arith.constant 0 : i32
    %164 = vector.broadcast %c0_i32_55 : i32 to vector<1x256xi32>
    %165 = arith.addi %10, %164 : vector<1x256xi32>
    %c0_i32_56 = arith.constant 0 : i32
    %166 = vector.broadcast %c0_i32_56 : i32 to vector<1x256xi32>
    %167 = arith.cmpi sge, %165, %166 : vector<1x256xi32>
    %c0_i32_57 = arith.constant 0 : i32
    %168 = vector.broadcast %c0_i32_57 : i32 to vector<1x256xi32>
    %169 = arith.addi %10, %168 : vector<1x256xi32>
    %c16_i32_58 = arith.constant 16 : i32
    %170 = vector.broadcast %c16_i32_58 : i32 to vector<1x256xi32>
    %171 = arith.cmpi slt, %169, %170 : vector<1x256xi32>
    %172 = arith.andi %167, %171 : vector<1x256xi1>
    %c1_i32_59 = arith.constant 1 : i32
    %173 = vector.broadcast %c1_i32_59 : i32 to vector<1x256xi32>
    %174 = arith.addi %12, %173 : vector<1x256xi32>
    %c0_i32_60 = arith.constant 0 : i32
    %175 = vector.broadcast %c0_i32_60 : i32 to vector<1x256xi32>
    %176 = arith.cmpi sge, %174, %175 : vector<1x256xi32>
    %177 = arith.andi %172, %176 : vector<1x256xi1>
    %c1_i32_61 = arith.constant 1 : i32
    %178 = vector.broadcast %c1_i32_61 : i32 to vector<1x256xi32>
    %179 = arith.addi %12, %178 : vector<1x256xi32>
    %c16_i32_62 = arith.constant 16 : i32
    %180 = vector.broadcast %c16_i32_62 : i32 to vector<1x256xi32>
    %181 = arith.cmpi slt, %179, %180 : vector<1x256xi32>
    %182 = arith.andi %177, %181 : vector<1x256xi1>
    %cst_63 = arith.constant 0.000000e+00 : f32
    %183 = vector.shape_cast %182 : vector<1x256xi1> to vector<1x256xi1>
    %184 = vector.broadcast %183 : vector<1x256xi1> to vector<32x256xi1>
    %185 = vector.broadcast %cst_63 : f32 to vector<32x256xf32>
    %186 = arith.select %184, %163, %185 : vector<32x256xi1>, vector<32x256xf32>
    %187 = vector.extract_strided_slice %7 {offsets = [0, 5], sizes = [32, 1], strides = [1, 1]} : vector<32x9xf32> to vector<32x1xf32>
    %188 = vector.broadcast %187 : vector<32x1xf32> to vector<32x256xf32>
    %189 = arith.mulf %188, %186 : vector<32x256xf32>
    %190 = arith.addf %160, %189 : vector<32x256xf32>
    %cst_64 = arith.constant 0.000000e+00 : f32
    %191 = vector.broadcast %cst_64 : f32 to vector<32x15xf32>
    %192 = vector.extract_strided_slice %6 {offsets = [0, 15], sizes = [32, 241], strides = [1, 1]} : vector<32x256xf32> to vector<32x241xf32>
    %193 = tpu.concatenate %192, %191 in 1 : vector<32x241xf32>, vector<32x15xf32> -> vector<32x256xf32>
    %c1_i32_65 = arith.constant 1 : i32
    %194 = vector.broadcast %c1_i32_65 : i32 to vector<1x256xi32>
    %195 = arith.addi %10, %194 : vector<1x256xi32>
    %c0_i32_66 = arith.constant 0 : i32
    %196 = vector.broadcast %c0_i32_66 : i32 to vector<1x256xi32>
    %197 = arith.cmpi sge, %195, %196 : vector<1x256xi32>
    %c1_i32_67 = arith.constant 1 : i32
    %198 = vector.broadcast %c1_i32_67 : i32 to vector<1x256xi32>
    %199 = arith.addi %10, %198 : vector<1x256xi32>
    %c16_i32_68 = arith.constant 16 : i32
    %200 = vector.broadcast %c16_i32_68 : i32 to vector<1x256xi32>
    %201 = arith.cmpi slt, %199, %200 : vector<1x256xi32>
    %202 = arith.andi %197, %201 : vector<1x256xi1>
    %c-1_i32_69 = arith.constant -1 : i32
    %203 = vector.broadcast %c-1_i32_69 : i32 to vector<1x256xi32>
    %204 = arith.addi %12, %203 : vector<1x256xi32>
    %c0_i32_70 = arith.constant 0 : i32
    %205 = vector.broadcast %c0_i32_70 : i32 to vector<1x256xi32>
    %206 = arith.cmpi sge, %204, %205 : vector<1x256xi32>
    %207 = arith.andi %202, %206 : vector<1x256xi1>
    %c-1_i32_71 = arith.constant -1 : i32
    %208 = vector.broadcast %c-1_i32_71 : i32 to vector<1x256xi32>
    %209 = arith.addi %12, %208 : vector<1x256xi32>
    %c16_i32_72 = arith.constant 16 : i32
    %210 = vector.broadcast %c16_i32_72 : i32 to vector<1x256xi32>
    %211 = arith.cmpi slt, %209, %210 : vector<1x256xi32>
    %212 = arith.andi %207, %211 : vector<1x256xi1>
    %cst_73 = arith.constant 0.000000e+00 : f32
    %213 = vector.shape_cast %212 : vector<1x256xi1> to vector<1x256xi1>
    %214 = vector.broadcast %213 : vector<1x256xi1> to vector<32x256xi1>
    %215 = vector.broadcast %cst_73 : f32 to vector<32x256xf32>
    %216 = arith.select %214, %193, %215 : vector<32x256xi1>, vector<32x256xf32>
    %217 = vector.extract_strided_slice %7 {offsets = [0, 6], sizes = [32, 1], strides = [1, 1]} : vector<32x9xf32> to vector<32x1xf32>
    %218 = vector.broadcast %217 : vector<32x1xf32> to vector<32x256xf32>
    %219 = arith.mulf %218, %216 : vector<32x256xf32>
    %220 = arith.addf %190, %219 : vector<32x256xf32>
    %cst_74 = arith.constant 0.000000e+00 : f32
    %221 = vector.broadcast %cst_74 : f32 to vector<32x16xf32>
    %222 = vector.extract_strided_slice %6 {offsets = [0, 16], sizes = [32, 240], strides = [1, 1]} : vector<32x256xf32> to vector<32x240xf32>
    %223 = tpu.concatenate %222, %221 in 1 : vector<32x240xf32>, vector<32x16xf32> -> vector<32x256xf32>
    %c1_i32_75 = arith.constant 1 : i32
    %224 = vector.broadcast %c1_i32_75 : i32 to vector<1x256xi32>
    %225 = arith.addi %10, %224 : vector<1x256xi32>
    %c0_i32_76 = arith.constant 0 : i32
    %226 = vector.broadcast %c0_i32_76 : i32 to vector<1x256xi32>
    %227 = arith.cmpi sge, %225, %226 : vector<1x256xi32>
    %c1_i32_77 = arith.constant 1 : i32
    %228 = vector.broadcast %c1_i32_77 : i32 to vector<1x256xi32>
    %229 = arith.addi %10, %228 : vector<1x256xi32>
    %c16_i32_78 = arith.constant 16 : i32
    %230 = vector.broadcast %c16_i32_78 : i32 to vector<1x256xi32>
    %231 = arith.cmpi slt, %229, %230 : vector<1x256xi32>
    %232 = arith.andi %227, %231 : vector<1x256xi1>
    %c0_i32_79 = arith.constant 0 : i32
    %233 = vector.broadcast %c0_i32_79 : i32 to vector<1x256xi32>
    %234 = arith.addi %12, %233 : vector<1x256xi32>
    %c0_i32_80 = arith.constant 0 : i32
    %235 = vector.broadcast %c0_i32_80 : i32 to vector<1x256xi32>
    %236 = arith.cmpi sge, %234, %235 : vector<1x256xi32>
    %237 = arith.andi %232, %236 : vector<1x256xi1>
    %c0_i32_81 = arith.constant 0 : i32
    %238 = vector.broadcast %c0_i32_81 : i32 to vector<1x256xi32>
    %239 = arith.addi %12, %238 : vector<1x256xi32>
    %c16_i32_82 = arith.constant 16 : i32
    %240 = vector.broadcast %c16_i32_82 : i32 to vector<1x256xi32>
    %241 = arith.cmpi slt, %239, %240 : vector<1x256xi32>
    %242 = arith.andi %237, %241 : vector<1x256xi1>
    %cst_83 = arith.constant 0.000000e+00 : f32
    %243 = vector.shape_cast %242 : vector<1x256xi1> to vector<1x256xi1>
    %244 = vector.broadcast %243 : vector<1x256xi1> to vector<32x256xi1>
    %245 = vector.broadcast %cst_83 : f32 to vector<32x256xf32>
    %246 = arith.select %244, %223, %245 : vector<32x256xi1>, vector<32x256xf32>
    %247 = vector.extract_strided_slice %7 {offsets = [0, 7], sizes = [32, 1], strides = [1, 1]} : vector<32x9xf32> to vector<32x1xf32>
    %248 = vector.broadcast %247 : vector<32x1xf32> to vector<32x256xf32>
    %249 = arith.mulf %248, %246 : vector<32x256xf32>
    %250 = arith.addf %220, %249 : vector<32x256xf32>
    %cst_84 = arith.constant 0.000000e+00 : f32
    %251 = vector.broadcast %cst_84 : f32 to vector<32x17xf32>
    %252 = vector.extract_strided_slice %6 {offsets = [0, 17], sizes = [32, 239], strides = [1, 1]} : vector<32x256xf32> to vector<32x239xf32>
    %253 = tpu.concatenate %252, %251 in 1 : vector<32x239xf32>, vector<32x17xf32> -> vector<32x256xf32>
    %c1_i32_85 = arith.constant 1 : i32
    %254 = vector.broadcast %c1_i32_85 : i32 to vector<1x256xi32>
    %255 = arith.addi %10, %254 : vector<1x256xi32>
    %c0_i32_86 = arith.constant 0 : i32
    %256 = vector.broadcast %c0_i32_86 : i32 to vector<1x256xi32>
    %257 = arith.cmpi sge, %255, %256 : vector<1x256xi32>
    %c1_i32_87 = arith.constant 1 : i32
    %258 = vector.broadcast %c1_i32_87 : i32 to vector<1x256xi32>
    %259 = arith.addi %10, %258 : vector<1x256xi32>
    %c16_i32_88 = arith.constant 16 : i32
    %260 = vector.broadcast %c16_i32_88 : i32 to vector<1x256xi32>
    %261 = arith.cmpi slt, %259, %260 : vector<1x256xi32>
    %262 = arith.andi %257, %261 : vector<1x256xi1>
    %c1_i32_89 = arith.constant 1 : i32
    %263 = vector.broadcast %c1_i32_89 : i32 to vector<1x256xi32>
    %264 = arith.addi %12, %263 : vector<1x256xi32>
    %c0_i32_90 = arith.constant 0 : i32
    %265 = vector.broadcast %c0_i32_90 : i32 to vector<1x256xi32>
    %266 = arith.cmpi sge, %264, %265 : vector<1x256xi32>
    %267 = arith.andi %262, %266 : vector<1x256xi1>
    %c1_i32_91 = arith.constant 1 : i32
    %268 = vector.broadcast %c1_i32_91 : i32 to vector<1x256xi32>
    %269 = arith.addi %12, %268 : vector<1x256xi32>
    %c16_i32_92 = arith.constant 16 : i32
    %270 = vector.broadcast %c16_i32_92 : i32 to vector<1x256xi32>
    %271 = arith.cmpi slt, %269, %270 : vector<1x256xi32>
    %272 = arith.andi %267, %271 : vector<1x256xi1>
    %cst_93 = arith.constant 0.000000e+00 : f32
    %273 = vector.shape_cast %272 : vector<1x256xi1> to vector<1x256xi1>
    %274 = vector.broadcast %273 : vector<1x256xi1> to vector<32x256xi1>
    %275 = vector.broadcast %cst_93 : f32 to vector<32x256xf32>
    %276 = arith.select %274, %253, %275 : vector<32x256xi1>, vector<32x256xf32>
    %277 = vector.extract_strided_slice %7 {offsets = [0, 8], sizes = [32, 1], strides = [1, 1]} : vector<32x9xf32> to vector<32x1xf32>
    %278 = vector.broadcast %277 : vector<32x1xf32> to vector<32x256xf32>
    %279 = arith.mulf %278, %276 : vector<32x256xf32>
    %280 = arith.addf %250, %279 : vector<32x256xf32>
    %c0_94 = arith.constant 0 : index
    %c0_95 = arith.constant 0 : index
    %281 = vector.load %arg5[%c0_94, %c0_95] : memref<32x1xf32, #tpu.memory_space<vmem>>, vector<32x1xf32>
    %282 = vector.broadcast %281 : vector<32x1xf32> to vector<32x256xf32>
    %283 = arith.addf %280, %282 : vector<32x256xf32>
    %284 = vector.extract_strided_slice %283 {offsets = [0, 0], sizes = [16, 256], strides = [1, 1]} : vector<32x256xf32> to vector<16x256xf32>
    %cst_96 = arith.constant 5.000000e-01 : f32
    %285 = vector.broadcast %cst_96 : f32 to vector<16x256xf32>
    %286 = arith.mulf %285, %284 : vector<16x256xf32>
    %cst_97 = arith.constant 0.707106769 : f32
    %287 = vector.broadcast %cst_97 : f32 to vector<16x256xf32>
    %288 = arith.mulf %284, %287 : vector<16x256xf32>
    %289 = math.absf %288 : vector<16x256xf32>
    %cst_98 = arith.constant 0.327591091 : f32
    %290 = vector.broadcast %cst_98 : f32 to vector<16x256xf32>
    %291 = arith.mulf %290, %289 : vector<16x256xf32>
    %cst_99 = arith.constant 1.000000e+00 : f32
    %292 = vector.broadcast %cst_99 : f32 to vector<16x256xf32>
    %293 = arith.addf %292, %291 : vector<16x256xf32>
    %cst_100 = arith.constant 1.000000e+00 : f32
    %294 = vector.broadcast %cst_100 : f32 to vector<16x256xf32>
    %295 = arith.divf %294, %293 : vector<16x256xf32>
    %cst_101 = arith.constant 1.06140542 : f32
    %296 = vector.broadcast %cst_101 : f32 to vector<16x256xf32>
    %297 = arith.mulf %296, %295 : vector<16x256xf32>
    %cst_102 = arith.constant -1.45315206 : f32
    %298 = vector.broadcast %cst_102 : f32 to vector<16x256xf32>
    %299 = arith.addf %297, %298 : vector<16x256xf32>
    %300 = arith.mulf %299, %295 : vector<16x256xf32>
    %cst_103 = arith.constant 1.42141378 : f32
    %301 = vector.broadcast %cst_103 : f32 to vector<16x256xf32>
    %302 = arith.addf %300, %301 : vector<16x256xf32>
    %303 = arith.mulf %302, %295 : vector<16x256xf32>
    %cst_104 = arith.constant -0.284496725 : f32
    %304 = vector.broadcast %cst_104 : f32 to vector<16x256xf32>
    %305 = arith.addf %303, %304 : vector<16x256xf32>
    %306 = arith.mulf %305, %295 : vector<16x256xf32>
    %cst_105 = arith.constant 0.254829586 : f32
    %307 = vector.broadcast %cst_105 : f32 to vector<16x256xf32>
    %308 = arith.addf %306, %307 : vector<16x256xf32>
    %309 = arith.mulf %308, %295 : vector<16x256xf32>
    %cst_106 = arith.constant 0.000000e+00 : f32
    %310 = vector.broadcast %cst_106 : f32 to vector<16x256xf32>
    %311 = arith.subf %310, %289 : vector<16x256xf32>
    %312 = arith.mulf %311, %289 : vector<16x256xf32>
    %313 = math.exp %312 : vector<16x256xf32>
    %314 = arith.mulf %309, %313 : vector<16x256xf32>
    %cst_107 = arith.constant 1.000000e+00 : f32
    %315 = vector.broadcast %cst_107 : f32 to vector<16x256xf32>
    %316 = arith.subf %315, %314 : vector<16x256xf32>
    %cst_108 = arith.constant 0.000000e+00 : f32
    %317 = vector.broadcast %cst_108 : f32 to vector<16x256xf32>
    %318 = arith.cmpf oge, %288, %317 : vector<16x256xf32>
    %cst_109 = arith.constant 0.000000e+00 : f32
    %319 = vector.broadcast %cst_109 : f32 to vector<16x256xf32>
    %320 = arith.subf %319, %316 : vector<16x256xf32>
    %321 = arith.select %318, %316, %320 : vector<16x256xi1>, vector<16x256xf32>
    %cst_110 = arith.constant 1.000000e+00 : f32
    %322 = vector.broadcast %cst_110 : f32 to vector<16x256xf32>
    %323 = arith.addf %322, %321 : vector<16x256xf32>
    %324 = arith.mulf %286, %323 : vector<16x256xf32>
    %325 = vector.extract_strided_slice %283 {offsets = [16, 0], sizes = [16, 256], strides = [1, 1]} : vector<32x256xf32> to vector<16x256xf32>
    %326 = arith.mulf %324, %325 : vector<16x256xf32>
    %c0_111 = arith.constant 0 : index
    %c0_112 = arith.constant 0 : index
    %327 = vector.load %arg6[%c0_111, %c0_112] : memref<8x16xf32, #tpu.memory_space<vmem>>, vector<8x16xf32>
    %cst_113 = arith.constant dense<0.000000e+00> : vector<8x256xf32>
    %328 = tpu.matmul %327, %326, %cst_113 {dimension_numbers = #tpu.dot_dimension_numbers<[1], [0], [0], [1], [0, 0, 1, 1], [], []>} : vector<8x16xf32>, vector<16x256xf32>, vector<8x256xf32> -> vector<8x256xf32>
    %c0_114 = arith.constant 0 : index
    %c0_115 = arith.constant 0 : index
    %329 = vector.load %arg7[%c0_114, %c0_115] : memref<8x1xf32, #tpu.memory_space<vmem>>, vector<8x1xf32>
    %330 = vector.broadcast %329 : vector<8x1xf32> to vector<8x256xf32>
    %331 = arith.addf %328, %330 : vector<8x256xf32>
    %c0_116 = arith.constant 0 : index
    %c0_117 = arith.constant 0 : index
    %c0_118 = arith.constant 0 : index
    %332 = vector.load %arg8[%c0_116, %c0_117, %c0_118] : memref<1x8x256xf32, #tpu.memory_space<vmem>>, vector<1x8x256xf32>
    %333 = vector.shape_cast %332 : vector<1x8x256xf32> to vector<8x256xf32>
    %334 = vector.shape_cast %331 : vector<8x256xf32> to vector<1x8x256xf32>
    tpu.vector_store %arg8[%c0_116, %c0_117, %c0_118], %334 {strides = array<i32>} : memref<1x8x256xf32, #tpu.memory_space<vmem>>, vector<1x8x256xf32>,
    return
  }
  func.func @transform_0(%arg0: i32) -> (i32, i32, i32) {
    %c0_i32 = arith.constant 0 : i32
    %c0_i32_0 = arith.constant 0 : i32
    %c0_i32_1 = arith.constant 0 : i32
    return %arg0, %c0_i32, %c0_i32_0 : i32, i32, i32
  }
  func.func @transform_1(%arg0: i32) -> (i32, i32) {
    %c0_i32 = arith.constant 0 : i32
    %c0_i32_0 = arith.constant 0 : i32
    %c0_i32_1 = arith.constant 0 : i32
    return %c0_i32, %c0_i32_0 : i32, i32
  }
  func.func @transform_2(%arg0: i32) -> (i32, i32) {
    %c0_i32 = arith.constant 0 : i32
    %c0_i32_0 = arith.constant 0 : i32
    %c0_i32_1 = arith.constant 0 : i32
    return %c0_i32, %c0_i32_0 : i32, i32
  }
  func.func @transform_3(%arg0: i32) -> (i32, i32) {
    %c0_i32 = arith.constant 0 : i32
    %c0_i32_0 = arith.constant 0 : i32
    %c0_i32_1 = arith.constant 0 : i32
    return %c0_i32, %c0_i32_0 : i32, i32
  }
  func.func @transform_4(%arg0: i32) -> (i32, i32) {
    %c0_i32 = arith.constant 0 : i32
    %c0_i32_0 = arith.constant 0 : i32
    %c0_i32_1 = arith.constant 0 : i32
    return %c0_i32, %c0_i32_0 : i32, i32
  }
  func.func @transform_5(%arg0: i32) -> (i32, i32) {
    %c0_i32 = arith.constant 0 : i32
    %c0_i32_0 = arith.constant 0 : i32
    %c0_i32_1 = arith.constant 0 : i32
    return %c0_i32, %c0_i32_0 : i32, i32
  }
  func.func @transform_6(%arg0: i32) -> (i32, i32) {
    %c0_i32 = arith.constant 0 : i32
    %c0_i32_0 = arith.constant 0 : i32
    %c0_i32_1 = arith.constant 0 : i32
    return %c0_i32, %c0_i32_0 : i32, i32
  }
  func.func @transform_7(%arg0: i32) -> (i32, i32, i32) {
    %c0_i32 = arith.constant 0 : i32
    %c0_i32_0 = arith.constant 0 : i32
    %c0_i32_1 = arith.constant 0 : i32
    return %arg0, %c0_i32, %c0_i32_0 : i32, i32, i32
  }
}

</mosaic_0001>

<bundles_post_ra>
// kernel: feed_forward_pallas.1
= control target key start
LH: loop header
LB: loop body
LE: loop exit
PB: predicated region body
PF: predicated region fallthrough
CT: control target
= control target key end

     0   :  { %s1610_s24 = smov 0   ;;  %s2586_s0 = inlined_call_operand.vmem [shape: f32[2,8,256], index: 0, kind: input, shape index: {}]   ;;  %s2587_s1 = inlined_call_operand.vmem [shape: f32[32,8], index: 1, kind: input, shape index: {}]   ;;  %s2588_s2 = inlined_call_operand.vmem [shape: f32[32,1], index: 2, kind: input, shape index: {}]   ;;  %s2589_s3 = inlined_call_operand.vmem [shape: f32[32,9], index: 3, kind: input, shape index: {}]   ;;  %s2590_s4 = inlined_call_operand.vmem [shape: f32[32,1], index: 4, kind: input, shape index: {}]   ;;  %s2591_s5 = inlined_call_operand.vmem [shape: f32[8,16], index: 5, kind: input, shape index: {}]   ;;  %s2592_s6 = inlined_call_operand.vmem [shape: f32[8,1], index: 6, kind: input, shape index: {}]   ;;  %s2593_s7 = inlined_call_operand.vmem [shape: f32[2,8,256], index: 7, kind: output, shape index: {}]  }
   0x1 LB: > { %s1450_s25 = sadd.s32 4294967295, %s1550_s24   ;;  %p1454_p0 = scmp.ge.s32.totalorder %s1550_s24, 1  ;;  %s1550_s24 = sphi %s1610_s24, %s17_s24  }
   0x2   : > { %p237_p1 = scmp.lt.s32.totalorder %s1550_s24, 3 }
   0x4   : > { %p238_p2 = pnand %p1454_p0, %p237_p1 }
   0x6   : > { %241 = sbr.rel (%p238_p2) target bundleno = 750 (0x2ee), region = 48 }
   0xd   : > { %p269_p3 = scmp.lt.s32.totalorder %s1450_s25, 1  ;;  %v1552_v0 = vmov 0.0   ;;  %v287_v1 = vld [vmem:[%s2588_s2 + $0x10] sm:$0xff]  ;;  %v1553_v2 = vmov 0   ;;  %v285_v3 = vld [vmem:[%s2588_s2] sm:$0xff]  ;;  %vm309_vm0 = vcmask 64512   ;;  %v415_v32 = vlaneseq }
   0xe   : > { %386 = vmatprep.mubr.f32.mxu0 %v1552_v0  ;;  %404 = vmatprep.mubr.f32.mxu1 %v1552_v0  ;;  %v281_v4 = vld [vmem:[%s2587_s1] sm:$0xff]  ;;  %v284_v7 = vld [vmem:[%s2587_s1 + $0x18] sm:$0xff]  ;;  %v286_v9 = vld [vmem:[%s2588_s2 + $0x8] sm:$0xff]  ;;  %v1554_v15 = vmov 1   ;;  %v1555_v16 = vmov 2   ;;  %v1556_v18 = vmov 3  }
   0xf   : > { %s2779_s25 = smov (!%p269_p3, %s1450_s25), 1  ;;  %1501 = vset.pattern.permute.xlu1 %v1553_v2  ;;  %1500 = vset.pattern.permute.xlu0 %v1553_v2  ;;  %v288_v8 = vld [vmem:[%s2588_s2 + $0x18] sm:$0xff]  ;;  %v282_v10 = vld [vmem:[%s2587_s1 + $0x8] sm:$0xff]  ;;  %v283_v12 = vld [vmem:[%s2587_s1 + $0x10] sm:$0xff]  ;;  %v1557_v20 = vmov 4   ;;  %v1558_v21 = vmov 5  }
  0x10   : > { %301 = vperm.xlu1 %1501, %v287_v1   ;;  %s1466_s30 = sshll.u32 %s2779_s25, 4  ;;  %291 = vperm.xlu0 %1500, %v285_v3   ;;  %v412_v11 = vld [vmem:[%s2589_s3 + $0x8] sm:$0xff]  ;;  %v1661_v13 = vld [vmem:[%s2589_s3] sm:$0xff]  ;;  %v1673_v17 = vld [vmem:[%s2589_s3 + $0x10] sm:$0xff]  ;;  %v1559_v22 = vmov 6   ;;  %v1560_v23 = vmov 7  }
  0x11   : > { %s273_s10 = scalar_lea.vmem %s2586_s0, %s1466_s30  ;;  %v1169_v14 = vld [vmem:[%s2590_s4 + $0x8] sm:$0xff]  ;;  %v1680_v19 = vld [vmem:[%s2589_s3 + $0x18] sm:$0xff]  ;;  %v1561_v24 = vmov 8   ;;  %v1168_v25 = vld [vmem:[%s2590_s4] sm:$0xff]  ;;  %v1714_v33 = vand.u32 127, %v415_v32  ;;  %v2644_v44 = vmov 0  ;;  %s278_s13 = scalar_lea.vmem %s2593_s7, %s1466_s30 }
  0x12   : > { %v280_v5 = vld [vmem:[%s273_s10 + $0x8] sm:$0xff]  ;;  %v279_v6 = vld [vmem:[%s273_s10] sm:$0xff]  ;;  %s1562_s15 = smov 15   ;;  %s1563_s16 = smov 17   ;;  %vm2611_vm10 = vcmask 138240   ;;  %vm2616_vm12 = vcmask 121856  }
  0x13   : > { %322 = vmatprep.subr.mxu0 %v280_v5  ;;  %1472 = vmatprep.subr.mxu1 %v280_v5  ;;  %v1721_v36 = vadd.s32 128, %v1714_v33  ;;  %v1726_v39 = vshra.s32 %v1714_v33, 4  ;;  %s1564_s17 = smov 1   ;;  %s1565_s18 = smov 16   ;;  %vm2622_vm15 = vcmask 7168  }
  0x14   : > { %323 = vmatpush1.msra.mxu0 %v279_v6  ;;  %1473 = vmatpush1.msra.mxu1 %v279_v6  ;;  %s1566_s19 = smov 113   ;;  %s1567_s20 = smov 127  }
  0x15   : > { %1459 = vmatmul.mubr.msk.f32.vlgmr.msra.gmra.mrb[0].mxu0 %vm309_vm0, %v281_v4  ;;  %1462 = vmatmul.mubr.msk.f32.vlgmr.msra.gmra.mrb[0].mxu1 %vm309_vm0, %v284_v7  ;;  %v1729_v40 = vshra.s32 %v1721_v36, 4  ;;  %vm734_vm1 = vcmp.ge.s32.totalorder %v1726_v39, 0  ;;  %vm736_vm2 = vcmp.lt.s32.totalorder %v1726_v39, 16  ;;  %s1568_s21 = smov 112   ;;  %s1569_s22 = smov 111  }
  0x16   : > { %392 = vmatprep.mubr.f32.mxu0 %v1552_v0  ;;  %306 = vperm.xlu1 %1501, %v288_v8   ;;  %vm1737_vm5 = vmand %vm734_vm1, %vm736_vm2 }
  0x17   : > { %296 = vperm.xlu0 %1500, %v286_v9   ;;  %1386 = vmatprep.mubr.f32.mxu1 %v1552_v0  ;;  %vm735_vm3 = vcmp.ge.s32.totalorder %v1729_v40, 0  ;;  %vm737_vm4 = vcmp.lt.s32.totalorder %v1729_v40, 16  ;;  %v2645_v44 = vsel %vm1737_vm5, 4294967295, %v2644_v44 }
  0x18   : > { %vm1741_vm6 = vmand %vm735_vm3, %vm737_vm4 }
  0x19   : > { %1460 = vmatmul.mubr.msk.f32.gmra.mrb[2].mxu0 %vm309_vm0, %v282_v10 }
  0x1a   : > { %398 = vmatprep.mubr.f32.mxu0 %v1552_v0  ;;  %500 = vperm.xlu1 %1501, %v412_v11  }
  0x1b   : > { %495 = vperm.xlu0 %1500, %v1661_v13  }
  0x1d   : > { %1461 = vmatmul.mubr.msk.f32.gmra.mrb[4].mxu0 %vm309_vm0, %v283_v12  ;;  %vm2612_vm0 = vcmask 130048  }
  0x1e   : > { %1502 = vset.pattern.permute.xlu1 %v1554_v15 }
  0x1f   : > { %587 = vperm.xlu1 %1502, %v412_v11   ;;  %1179 = vperm.xlu0 %1500, %v1169_v14  }
  0x23   : > { %1503 = vset.pattern.permute.xlu1 %v1555_v16  ;;  %1511 = vset.pattern.permute.xlu0 %v1554_v15 }
  0x24   : > { %670 = vperm.xlu1 %1503, %v1661_v13   ;;  %583 = vperm.xlu0 %1511, %v1661_v13  }
  0x28   : > { %1504 = vset.pattern.permute.xlu1 %v1556_v18  ;;  %591 = vperm.xlu0 %1511, %v1673_v17  }
  0x29   : > { %757 = vperm.xlu1 %1504, %v1661_v13  }
  0x2c   : > { %1512 = vset.pattern.permute.xlu0 %v1555_v16 }
  0x2d   : > { %761 = vperm.xlu1 %1504, %v412_v11   ;;  %674 = vperm.xlu0 %1512, %v412_v11  }
  0x31   : > { %1505 = vset.pattern.permute.xlu1 %v1557_v20  ;;  %682 = vperm.xlu0 %1512, %v1680_v19  }
  0x32   : > { %809 = vperm.xlu1 %1505, %v412_v11  }
  0x35   : > { %1515 = vset.pattern.permute.xlu0 %v1557_v20 }
  0x36   : > { %1506 = vset.pattern.permute.xlu1 %v1558_v21  ;;  %805 = vperm.xlu0 %1515, %v1661_v13  }
  0x37   : > { %886 = vperm.xlu1 %1506, %v1661_v13  }
  0x3a   : > { %813 = vperm.xlu0 %1515, %v1673_v17  }
  0x3b   : > { %1507 = vset.pattern.permute.xlu1 %v1559_v22 }
  0x3c   : > { %979 = vperm.xlu1 %1507, %v412_v11  }
  0x3e   : > { %1517 = vset.pattern.permute.xlu0 %v1558_v21 }
  0x3f   : > { %890 = vperm.xlu0 %1517, %v412_v11  }
  0x40   : > { %1508 = vset.pattern.permute.xlu1 %v1560_v23 }
  0x41   : > { %1056 = vperm.xlu1 %1508, %v1661_v13  }
  0x43   : > { %898 = vperm.xlu0 %1517, %v1680_v19  }
  0x45   : > { %1509 = vset.pattern.permute.xlu1 %v1561_v24 }
  0x46   : > { %1141 = vperm.xlu1 %1509, %v412_v11  }
  0x47   : > { %1520 = vset.pattern.permute.xlu0 %v1559_v22 }
  0x48   : > { %975 = vperm.xlu0 %1520, %v1661_v13  }
  0x4a   : > { %1510 = vset.pattern.permute.xlu1 %v1553_v2 }
  0x4b   : > { %1174 = vperm.xlu1 %1510, %v1168_v25  }
  0x4c   : > { %983 = vperm.xlu0 %1520, %v1673_v17  }
  0x4f   : > { %510 = vperm.xlu1 %1510, %v1680_v19  }
  0x50   : > { %1521 = vset.pattern.permute.xlu0 %v1560_v23 }
  0x51   : > { %1060 = vperm.xlu0 %1521, %v412_v11  }
  0x53   : > { %1513 = vset.pattern.permute.xlu1 %v1554_v15 }
  0x54   : > { %595 = vperm.xlu1 %1513, %v1680_v19  }
  0x55   : > { %1068 = vperm.xlu0 %1521, %v1680_v19  }
  0x58   : > { %1514 = vset.pattern.permute.xlu1 %v1555_v16 }
  0x59   : > { %678 = vperm.xlu1 %1514, %v1673_v17   ;;  %1524 = vset.pattern.permute.xlu0 %v1561_v24 }
  0x5d   : > { %1516 = vset.pattern.permute.xlu1 %v1556_v18 }
  0x5e   : > { %765 = vperm.xlu1 %1516, %v1673_v17  }
  0x62   : > { %769 = vperm.xlu1 %1516, %v1680_v19  }
  0x66   : > { %1518 = vset.pattern.permute.xlu1 %v1557_v20 }
  0x67   : > { %817 = vperm.xlu1 %1518, %v1680_v19  }
  0x6b   : > { %1519 = vset.pattern.permute.xlu1 %v1558_v21 }
  0x6c   : > { %894 = vperm.xlu1 %1519, %v1673_v17  }
  0x70   : > { %1522 = vset.pattern.permute.xlu1 %v1559_v22 }
  0x71   : > { %987 = vperm.xlu1 %1522, %v1680_v19  }
  0x75   : > { %1523 = vset.pattern.permute.xlu1 %v1560_v23 }
  0x76   : > { %1064 = vperm.xlu1 %1523, %v1673_v17  }
  0x7a   : > { %1526 = vset.pattern.permute.xlu1 %v1561_v24 }
  0x8f   : > { %v292_v26 = vpop.permute.xlu0 %291  ;;  %v1716_v34 = vpop.permute.xlu1 %301 }
  0x95   : > { %v307_v37 = vpop.permute.xlu1 %306 }
  0x96   : > { %v1704_v27 = vpop.permute.xlu0 %296 }
  0x99   : > { %v1735_v41 = vpop.permute.xlu1 %500 }
  0x9a   : > { %v1706_v28 = vpop.permute.xlu0 %495 }
  0x9e   : > { %v1708_v29 = vpop.permute.xlu0 %1179  ;;  %v1753_v55 = vpop.permute.xlu1 %587 }
  0x9f   : > { %2642 = vst [vmem:[#allocation2_spill] sm:$0xff] %v1708_v29 }
  0xa3   : > { %v1710_v30 = vpop.permute.xlu0 %583  ;;  %v1763_v60 = vpop.permute.xlu1 %670 }
  0xa7   : > { %v1712_v31 = vpop.permute.xlu0 %591 }
  0xa8   : > { %2643 = vst [vmem:[#allocation3_spill] sm:$0xff] %v1712_v31  ;;  %v1769_v61 = vpop.permute.xlu1 %757 }
  0xac   : > { %v1718_v35 = vpop.permute.xlu0 %674  ;;  %v1777_v63 = vpop.permute.xlu1 %761 }
  0xb0   : > { %v1723_v38 = vpop.permute.xlu0 %682 }
  0xb1   : > { %v1785_v0 = vpop.permute.xlu1 %809 }
  0xb2   : > { %2648 = vst [vmem:[#allocation4_spill] sm:$0xff] %v1785_v0 }
  0xb5   : > { %v806_v42 = vpop.permute.xlu0 %805 }
  0xb6   : > { %v1791_v3 = vpop.permute.xlu1 %886 }
  0xbb   : > { %v1802_v5 = vpop.permute.xlu1 %979 }
  0xbc   : > { %2650 = vst [vmem:[#allocation6_spill] sm:$0xff] %v1802_v5 }
  0xc0   : > { %v1807_v6 = vpop.permute.xlu1 %1056 }
  0xc5   : > { %v1816_v7 = vpop.permute.xlu1 %1141 }
  0xc6   : > { %2651 = vst [vmem:[#allocation7_spill] sm:$0xff] %v1816_v7 }
  0xca   : > { %v1825_v9 = vpop.permute.xlu1 %1174 }
  0xce   : > { %v1834_v10 = vpop.permute.xlu1 %510 }
  0xd3   : > { %v1840_v11 = vpop.permute.xlu1 %595 }
  0xd8   : > { %v1849_v12 = vpop.permute.xlu1 %678 }
  0xd9   : > { %2652 = vst [vmem:[#allocation8_spill] sm:$0xff] %v1849_v12 }
  0xdd   : > { %v1859_v15 = vpop.permute.xlu1 %765 }
  0xde   : > { %2655 = vst [vmem:[#allocation11_spill] sm:$0xff] %v1859_v15 }
  0xe1   : > { %v1871_v18 = vpop.permute.xlu1 %769 }
  0xe6   : > { %v1883_v21 = vpop.permute.xlu1 %817 }
  0xe8   : > { %v388_v43 = vpop.f32.mrb[0].mxu0  ;;  %v406_v45 = vpop.f32.mrb[0].mxu1 }
  0xe9   : > { %v389_v46 = vadd.f32 %v388_v43, %v292_v26  ;;  %v390_v47 = vpop.f32.mrb[1].mxu0  ;;  %v408_v49 = vpop.f32.mrb[1].mxu1  ;;  %v1771_v62 = vadd.f32 %v406_v45, %v307_v37 }
  0xea   : > { %v391_v50 = vadd.f32 %v390_v47, %v292_v26  ;;  %v1789_v1 = vadd.f32 %v408_v49, %v307_v37  ;;  %v420_v26 = vand.u32 15, %v1714_v33  ;;  %v1171_v33 = vld [vmem:[%s2590_s4 + $0x18] sm:$0xff]  ;;  %v2667_v49 = vmov 0 }
  0xeb   : > { %v796_v51 = vsel %vm1737_vm5, %v389_v46, 0.0  ;;  %614 = vrot.lane.b32.xlu1 %v389_v46, %s1562_s15  ;;  %430 = vrot.lane.b32.xlu0 %v389_v46, %s1563_s16  ;;  %v1890_v22 = vpop.permute.xlu1 %894 }
  0xec   : > { %v797_v52 = vsel %vm1741_vm6, %v391_v50, 0.0  ;;  %v1751_v53 = vmul.f32 %v806_v42, %v796_v51  ;;  %v394_v54 = vpop.f32.mrb[2].mxu0  ;;  %2657 = vst [vmem:[#allocation13_spill] sm:$0xff] %v1890_v22  ;;  %v1928_v37 = vadd.s32 1, %v420_v26 }
  0xed   : > { %v1755_v56 = vmul.f32 %v806_v42, %v797_v52  ;;  %v396_v57 = vpop.f32.mrb[3].mxu0  ;;  %v1797_v4 = vadd.f32 %v394_v54, %v1704_v27 }
  0xee   : > { %v1823_v8 = vadd.f32 %v396_v57, %v1704_v27  ;;  %v463_v27 = vadd.s32 4294967295, %v1726_v39  ;;  %vm2615_vm13 = vcmp.lt.s32.totalorder %v1928_v37, 16  ;;  %v1313_v57 = vld [vmem:[%s2592_s6] sm:$0xff] }
  0xef   : > { %701 = vrot.lane.b32.xlu1 %v389_v46, %s1564_s17  ;;  %529 = vrot.lane.b32.xlu0 %v389_v46, %s1565_s18  ;;  %2649 = vst [vmem:[#allocation5_spill] sm:$0xff] %v1797_v4 }
  0xf0   : > { %v1759_v58 = vpop.f32.mrb[4].mxu0  ;;  %vm465_vm7 = vcmp.ge.s32.totalorder %v463_v27, 0  ;;  %vm467_vm8 = vcmp.lt.s32.totalorder %v463_v27, 16 }
  0xf1   : > { %v1761_v59 = vpop.f32.mrb[5].mxu0  ;;  %vm1932_vm9 = vmand %vm465_vm7, %vm467_vm8 }
  0xf2   : > { %v1898_v24 = vadd.f32 %v1761_v59, %v1716_v34  ;;  %vm1955_vm1 = vmand %vm1932_vm9, %vm2615_vm13 }
  0xf3   : > { %917 = vrot.lane.b32.xlu1 %v389_v46, %s1566_s19  ;;  %836 = vrot.lane.b32.xlu0 %v389_v46, %s1567_s20  ;;  %v2668_v49 = vsel %vm1955_vm1, 4294967295, %v2667_v49 }
  0xf7   : > { %1006 = vrot.lane.b32.xlu1 %v389_v46, %s1568_s21  ;;  %1087 = vrot.lane.b32.xlu0 %v389_v46, %s1569_s22 }
  0xfb   : > { %626 = vrot.lane.b32.xlu1 %v1771_v62, %s1562_s15  ;;  %442 = vrot.lane.b32.xlu0 %v1771_v62, %s1563_s16 }
  0xff   : > { %432 = vrot.lane.b32.xlu1 %v391_v50, %s1563_s16  ;;  %541 = vrot.lane.b32.xlu0 %v1771_v62, %s1565_s18 }
 0x103   : > { %531 = vrot.lane.b32.xlu1 %v391_v50, %s1565_s18  ;;  %713 = vrot.lane.b32.xlu0 %v1771_v62, %s1564_s17 }
 0x107   : > { %703 = vrot.lane.b32.xlu1 %v391_v50, %s1564_s17  ;;  %616 = vrot.lane.b32.xlu0 %v391_v50, %s1562_s15 }
 0x10b   : > { %838 = vrot.lane.b32.xlu1 %v391_v50, %s1567_s20  ;;  %628 = vrot.lane.b32.xlu0 %v1789_v1, %s1562_s15 }
 0x10f   : > { %919 = vrot.lane.b32.xlu1 %v391_v50, %s1566_s19  ;;  %434 = vrot.lane.b32.xlu0 %v1797_v4, %s1563_s16 }
 0x113   : > { %1008 = vrot.lane.b32.xlu1 %v391_v50, %s1568_s21  ;;  %533 = vrot.lane.b32.xlu0 %v1797_v4, %s1565_s18 }
 0x117   : > { %1089 = vrot.lane.b32.xlu1 %v391_v50, %s1569_s22  ;;  %705 = vrot.lane.b32.xlu0 %v1797_v4, %s1564_s17 }
 0x11b   : > { %444 = vrot.lane.b32.xlu1 %v1789_v1, %s1563_s16  ;;  %921 = vrot.lane.b32.xlu0 %v1797_v4, %s1566_s19 }
 0x11f   : > { %543 = vrot.lane.b32.xlu1 %v1789_v1, %s1565_s18  ;;  %1010 = vrot.lane.b32.xlu0 %v1797_v4, %s1568_s21 }
 0x123   : > { %715 = vrot.lane.b32.xlu1 %v1789_v1, %s1564_s17  ;;  %620 = vrot.lane.b32.xlu0 %v1823_v8, %s1562_s15 }
 0x127   : > { %618 = vrot.lane.b32.xlu1 %v1797_v4, %s1562_s15  ;;  %1137 = vperm.xlu0 %1524, %v1661_v13   ;;  %v1851_v13 = vpop.permute.xlu0 %813 }
 0x128   : > { %2653 = vst [vmem:[#allocation9_spill] sm:$0xff] %v1851_v13 }
 0x12b   : > { %840 = vrot.lane.b32.xlu1 %v1797_v4, %s1567_s20  ;;  %923 = vrot.lane.b32.xlu0 %v1823_v8, %s1566_s19  ;;  %v1857_v14 = vpop.permute.xlu0 %890 }
 0x12c   : > { %2654 = vst [vmem:[#allocation10_spill] sm:$0xff] %v1857_v14 }
 0x12f   : > { %1091 = vrot.lane.b32.xlu1 %v1797_v4, %s1569_s22  ;;  %1012 = vrot.lane.b32.xlu0 %v1823_v8, %s1568_s21  ;;  %v1867_v16 = vpop.permute.xlu0 %898 }
 0x133   : > { %436 = vrot.lane.b32.xlu1 %v1823_v8, %s1563_s16  ;;  %1145 = vperm.xlu0 %1524, %v1673_v17   ;;  %v1881_v20 = vpop.permute.xlu0 %975 }
 0x137   : > { %535 = vrot.lane.b32.xlu1 %v1823_v8, %s1565_s18  ;;  %1525 = vset.pattern.permute.xlu0 %v1553_v2  ;;  %v1892_v23 = vpop.permute.xlu0 %983 }
 0x138   : > { %505 = vperm.xlu0 %1525, %v1673_v17   ;;  %v1875_v17 = vadd.f32 %v1759_v58, %v1716_v34  ;;  %2658 = vst [vmem:[#allocation14_spill] sm:$0xff] %v1892_v23  ;;  %v1921_v34 = vadd.s32 4294967295, %v420_v26  ;;  %v2669_v58 = vmov 0 }
 0x13a   : > { %2656 = vst [vmem:[#allocation12_spill] sm:$0xff] %v1875_v17  ;;  %vm2614_vm11 = vcmp.ge.s32.totalorder %v1921_v34, 0 }
 0x13b   : > { %850 = vrot.lane.b32.xlu1 %v1789_v1, %s1567_s20  ;;  %v1907_v25 = vpop.permute.xlu0 %1060  ;;  %vm1944_vm14 = vmand %vm1932_vm9, %vm2614_vm11 }
 0x13c   : > { %931 = vrot.lane.b32.xlu0 %v1789_v1, %s1566_s19  ;;  %2660 = vst [vmem:[#allocation16_spill] sm:$0xff] %v1907_v25  ;;  %vm1974_vm2 = vmand %vm1737_vm5, %vm2614_vm11 }
 0x13d   : > { %v2670_v58 = vsel %vm1974_vm2, 4294967295, %v2669_v58 }
 0x13f   : > { %848 = vrot.lane.b32.xlu1 %v1771_v62, %s1567_s20 }
 0x140   : > { %929 = vrot.lane.b32.xlu0 %v1771_v62, %s1566_s19 }
 0x143   : > { %707 = vrot.lane.b32.xlu1 %v1823_v8, %s1564_s17 }
 0x144   : > { %438 = vrot.lane.b32.xlu0 %v1875_v17, %s1563_s16 }
 0x147   : > { %842 = vrot.lane.b32.xlu1 %v1823_v8, %s1567_s20 }
 0x148   : > { %537 = vrot.lane.b32.xlu0 %v1875_v17, %s1565_s18 }
 0x14b   : > { %1149 = vperm.xlu1 %1526, %v1680_v19   ;;  %v1905_v19 = vpop.permute.xlu1 %987 }
 0x14c   : > { %844 = vrot.lane.b32.xlu0 %v1875_v17, %s1567_s20  ;;  %2659 = vst [vmem:[#allocation15_spill] sm:$0xff] %v1905_v19 }
 0x14f   : > { %1093 = vrot.lane.b32.xlu1 %v1823_v8, %s1569_s22  ;;  %v1917_v32 = vpop.permute.xlu1 %1064 }
 0x150   : > { %624 = vrot.lane.b32.xlu0 %v1898_v24, %s1562_s15  ;;  %1527 = vset.pattern.permute.xlu1 %v1553_v2  ;;  %2661 = vst [vmem:[#allocation17_spill] sm:$0xff] %v1917_v32  ;;  %v1919_v2 = vpop.permute.xlu0 %1068 }
 0x151   : > { %2662 = vst [vmem:[#allocation18_spill] sm:$0xff] %v1919_v2 }
 0x153   : > { %622 = vrot.lane.b32.xlu1 %v1875_v17, %s1562_s15 }
 0x154   : > { %1020 = vrot.lane.b32.xlu0 %v1789_v1, %s1568_s21 }
 0x157   : > { %709 = vrot.lane.b32.xlu1 %v1875_v17, %s1564_s17 }
 0x158   : > { %1018 = vrot.lane.b32.xlu0 %v1771_v62, %s1568_s21 }
 0x15b   : > { %925 = vrot.lane.b32.xlu1 %v1875_v17, %s1566_s19 }
 0x15c   : > { %1189 = vperm.xlu0 %1525, %v1171_v33  }
 0x15d   : > { %v1938_v43 = vpop.permute.xlu1 %614  ;;  %v431_v45 = vpop.permute.xlu0 %430 }
 0x15e   : > { %v459_v47 = vsel %vm2611_vm10, 0.0, %v431_v45  ;;  %v643_v50 = vsel %vm2616_vm12, 0.0, %v1938_v43 }
 0x15f   : > { %440 = vrot.lane.b32.xlu1 %v1898_v24, %s1563_s16  ;;  %v485_v51 = vsel %vm1944_vm14, %v459_v47, 0.0  ;;  %v661_v27 = vsel %vm1955_vm1, %v643_v50, 0.0 }
 0x160   : > { %1095 = vrot.lane.b32.xlu0 %v1875_v17, %s1569_s22  ;;  %v513_v47 = vmul.f32 %v1706_v28, %v485_v51  ;;  %v685_v50 = vmul.f32 %v1763_v60, %v661_v27 }
 0x161   : > { %v1965_v52 = vpop.permute.xlu1 %701  ;;  %v530_v54 = vpop.permute.xlu0 %529 }
 0x162   : > { %v730_v59 = vsel %vm2622_vm15, 0.0, %v1965_v52  ;;  %v558_v26 = vsel %vm2612_vm0, 0.0, %v530_v54 }
 0x163   : > { %v574_v33 = vsel %vm1932_vm9, %v558_v26, 0.0  ;;  %539 = vrot.lane.b32.xlu1 %v1898_v24, %s1565_s18  ;;  %v748_v23 = vsel %vm1974_vm2, %v730_v59, 0.0  ;;  %v421_v26 = vand.u32 15, %v1721_v36  ;;  %v464_v59 = vadd.s32 4294967295, %v1729_v40 }
 0x164   : > { %v598_v32 = vmul.f32 %v1710_v30, %v574_v33  ;;  %1316 = vperm.xlu0 %1525, %v1313_v57   ;;  %v772_v51 = vmul.f32 %v1769_v61, %v748_v23  ;;  %v1170_v57 = vld [vmem:[%s2590_s4 + $0x10] sm:$0xff] }
 0x165   : > { %v1991_v22 = vpop.permute.xlu1 %917  ;;  %v1993_v2 = vpop.permute.xlu0 %836  ;;  %vm466_vm3 = vcmp.ge.s32.totalorder %v464_v59, 0  ;;  %vm468_vm4 = vcmp.lt.s32.totalorder %v464_v59, 16  ;;  %v2032_v59 = vadd.s32 1, %v421_v26 }
 0x166   : > { %v606_v15 = vadd.f32 %v598_v32, %v513_v47  ;;  %v2008_v32 = vadd.s32 4294967295, %v421_v26  ;;  %vm2021_vm7 = vmand %vm466_vm3, %vm468_vm4 }
 0x167   : > { %1014 = vrot.lane.b32.xlu1 %v1875_v17, %s1568_s21  ;;  %v802_v17 = vsel %vm1737_vm5, %v1771_v62, 0.0  ;;  %vm2621_vm4 = vcmp.lt.s32.totalorder %v2032_v59, 16 }
 0x168   : > { %v693_v12 = vadd.f32 %v685_v50, %v606_v15  ;;  %vm2613_vm8 = vcmp.ge.s32.totalorder %v2008_v32, 0 }
 0x169   : > { %v2004_v33 = vpop.permute.xlu1 %1006  ;;  %v2006_v31 = vpop.permute.xlu0 %1087  ;;  %vm2038_vm3 = vmand %vm2021_vm7, %vm2613_vm8 }
 0x16a   : > { %v780_v27 = vadd.f32 %v772_v51, %v693_v12 }
 0x16b   : > { %1184 = vperm.xlu1 %1527, %v1170_v57  }
 0x16c   : > { %v2011_v36 = vadd.f32 %v1751_v53, %v780_v27 }
 0x16d   : > { %v2013_v15 = vpop.permute.xlu1 %626  ;;  %v2015_v23 = vpop.permute.xlu0 %442 }
 0x16e   : > { %v462_v47 = vsel %vm2611_vm10, 0.0, %v2015_v23  ;;  %v646_v53 = vsel %vm2616_vm12, 0.0, %v2013_v15 }
 0x16f   : > { %711 = vrot.lane.b32.xlu1 %v1898_v24, %s1564_s17  ;;  %v491_v50 = vsel %vm1944_vm14, %v462_v47, 0.0  ;;  %v667_v47 = vsel %vm1955_vm1, %v646_v53, 0.0  ;;  %v951_v53 = vadd.s32 1, %v1729_v40  ;;  %vm2680_vm1 = vcmp.lt.s32.totalorder %v1928_v37, 16 }
 0x170   : > { %v519_v29 = vmul.f32 %v1834_v10, %v491_v50  ;;  %v691_v5 = vmul.f32 %v1723_v38, %v667_v47 }
 0x171   : > { %v433_v51 = vpop.permute.xlu1 %432  ;;  %v2030_v57 = vpop.permute.xlu0 %541  ;;  %vm955_vm12 = vcmp.lt.s32.totalorder %v951_v53, 16 }
 0x172   : > { %v447_v19 = vsel %vm2611_vm10, %v431_v45, %v433_v51  ;;  %v561_v13 = vsel %vm2612_vm0, 0.0, %v2030_v57  ;;  %vm2078_vm10 = vmand %vm1741_vm6, %vm2613_vm8 }
 0x173   : > { %v580_v26 = vsel %vm1932_vm9, %v561_v13, 0.0  ;;  %846 = vrot.lane.b32.xlu1 %v1898_v24, %s1567_s20  ;;  %v486_v51 = vsel %vm2038_vm3, %v447_v19, 0.0  ;;  %v950_v13 = vadd.s32 1, %v1726_v39 }
 0x174   : > { %v604_v45 = vmul.f32 %v1840_v11, %v580_v26  ;;  %v826_v26 = vmul.f32 %v1883_v21, %v802_v17  ;;  %v514_v39 = vmul.f32 %v1706_v28, %v486_v51 }
 0x175   : > { %v532_v7 = vpop.permute.xlu1 %531  ;;  %v2058_v25 = vpop.permute.xlu0 %713  ;;  %vm952_vm8 = vcmp.ge.s32.totalorder %v950_v13, 0  ;;  %vm954_vm13 = vcmp.lt.s32.totalorder %v950_v13, 16 }
 0x176   : > { %v612_v14 = vadd.f32 %v604_v45, %v519_v29  ;;  %v546_v0 = vsel %vm2612_vm0, %v530_v54, %v532_v7  ;;  %v733_v50 = vsel %vm2622_vm15, 0.0, %v2058_v25  ;;  %vm2089_vm0 = vmand %vm2021_vm7, %vm2621_vm4 }
 0x177   : > { %v575_v19 = vsel %vm2021_vm7, %v546_v0, 0.0  ;;  %v754_v4 = vsel %vm1974_vm2, %v733_v50, 0.0  ;;  %927 = vrot.lane.b32.xlu1 %v1898_v24, %s1566_s19  ;;  %vm2679_vm2 = vcmask 121856   ;;  %vm2101_vm4 = vmand %vm1737_vm5, %vm2680_vm1  ;;  %v2686_v50 = vmov 0 }
 0x178   : > { %v599_v40 = vmul.f32 %v1710_v30, %v575_v19  ;;  %v699_v7 = vadd.f32 %v691_v5, %v612_v14  ;;  %v778_v0 = vmul.f32 %v1871_v18, %v754_v4  ;;  %v2681_v5 = vmov 0  ;;  %vm2121_vm1 = vmand %vm952_vm8, %vm954_vm13 }
 0x179   : > { %v704_v54 = vpop.permute.xlu1 %703  ;;  %v617_v47 = vpop.permute.xlu0 %616  ;;  %v2682_v5 = vsel %vm2101_vm4, 4294967295, %v2681_v5  ;;  %v2687_v50 = vsel %vm2121_vm1, 4294967295, %v2686_v50  ;;  %vm2693_vm8 = vcmask 121856  }
 0x17a   : > { %v607_v28 = vadd.f32 %v599_v40, %v514_v39  ;;  %v786_v45 = vadd.f32 %v778_v0, %v699_v7  ;;  %v718_v30 = vsel %vm2622_vm15, %v1965_v52, %v704_v54  ;;  %v631_v4 = vsel %vm2679_vm2, %v1938_v43, %v617_v47 }
 0x17b   : > { %v749_v14 = vsel %vm2078_vm10, %v718_v30, 0.0  ;;  %v662_v51 = vsel %vm2089_vm0, %v631_v4, 0.0  ;;  %1016 = vrot.lane.b32.xlu1 %v1898_v24, %s1568_s21  ;;  %vm2683_vm2 = vcmp.lt.s32.totalorder %v2032_v59, 16  ;;  %v2684_v43 = vmov 0 }
 0x17c   : > { %vm2115_vm11 = vmand %vm1741_vm6, %vm2683_vm2  ;;  %v686_v52 = vmul.f32 %v1763_v60, %v662_v51  ;;  %v2125_v19 = vadd.f32 %v826_v26, %v786_v45  ;;  %v773_v39 = vmul.f32 %v1769_v61, %v749_v14  ;;  %vm2688_vm15 = vcmp.ge.s32.totalorder %v951_v53, 0 }
 0x17d   : > { %v2685_v43 = vsel %vm2115_vm11, 4294967295, %v2684_v43  ;;  %v839_v40 = vpop.permute.xlu1 %838  ;;  %v629_v7 = vpop.permute.xlu0 %628  ;;  %vm2130_vm5 = vmand %vm2688_vm15, %vm955_vm12  ;;  %v2689_v0 = vmov 0  ;;  %vm2691_vm2 = vcmask 1039360   ;;  %vm2625_vm12 = vcmask 924672  }
 0x17e   : > { %v2690_v0 = vsel %vm2130_vm5, 4294967295, %v2689_v0  ;;  %v694_v54 = vadd.f32 %v686_v52, %v607_v28  ;;  %v853_v60 = vsel %vm2691_vm2, %v1993_v2, %v839_v40  ;;  %vm2692_vm13 = vmmov %vm2691_vm2  ;;  %v634_v26 = vsel %vm2693_vm8, %v2013_v15, %v629_v7 }
 0x17f   : > { %v865_v13 = vsel %vm2692_vm13, %v839_v40, 0.0  ;;  %v877_v61 = vsel %vm2101_vm4, %v853_v60, 0.0  ;;  %1097 = vrot.lane.b32.xlu1 %v1898_v24, %s1569_s22  ;;  %vm2694_vm15 = vcmp.ge.s32.totalorder %v1921_v34, 0  ;;  %v2695_v2 = vmov 0 }
 0x180   : > { %v878_v47 = vsel %vm2115_vm11, %v865_v13, 0.0  ;;  %vm2149_vm2 = vmand %vm2121_vm1, %vm2694_vm15  ;;  %v781_v53 = vadd.f32 %v773_v39, %v694_v54  ;;  %v901_v15 = vmul.f32 %v1791_v3, %v877_v61  ;;  %vm2697_vm13 = vcmp.ge.s32.totalorder %v2008_v32, 0 }
 0x181   : > { %v2696_v2 = vsel %vm2149_vm2, 4294967295, %v2695_v2  ;;  %vm2158_vm8 = vmand %vm2130_vm5, %vm2697_vm13  ;;  %v2698_v28 = vmov 0  ;;  %v902_v45 = vmul.f32 %v1791_v3, %v878_v47  ;;  %v920_v34 = vpop.permute.xlu1 %919  ;;  %vm2628_vm15 = vcmask 916480   ;;  %v2176_v39 = vpop.permute.xlu0 %434 }
 0x182   : > { %v2699_v28 = vsel %vm2158_vm8, 4294967295, %v2698_v28  ;;  %v829_v30 = vadd.f32 %v1755_v56, %v781_v53  ;;  %v909_v4 = vadd.f32 %v901_v15, %v2011_v36  ;;  %v934_v14 = vsel %vm2625_vm12, %v1991_v22, %v920_v34 }
 0x183   : > { %v946_v51 = vsel %vm2625_vm12, %v920_v34, 0.0  ;;  %v966_v32 = vsel %vm2149_vm2, %v934_v14, 0.0  ;;  %1101 = vrot.lane.b32.xlu1 %v1789_v1, %s1569_s22  ;;  %vm2700_vm13 = vcmask 138240   ;;  %vm2701_vm12 = vcmask 130048  }
 0x184   : > { %v967_v52 = vsel %vm2158_vm8, %v946_v51, 0.0  ;;  %v910_v3 = vadd.f32 %v902_v45, %v829_v30  ;;  %v990_v56 = vmul.f32 %v1881_v20, %v966_v32 }
 0x185   : > { %v991_v36 = vmul.f32 %v1881_v20, %v967_v52  ;;  %v1009_v22 = vpop.permute.xlu1 %1008  ;;  %v534_v47 = vpop.permute.xlu0 %533 }
 0x186   : > { %v998_v40 = vadd.f32 %v990_v56, %v909_v4  ;;  %v1023_v54 = vsel %vm2628_vm15, %v2004_v33, %v1009_v22 }
 0x187   : > { %v999_v7 = vadd.f32 %v991_v36, %v910_v3  ;;  %v1047_v60 = vsel %vm2121_vm1, %v1023_v54, 0.0  ;;  %1099 = vrot.lane.b32.xlu1 %v1771_v62, %s1569_s22  ;;  %v668_v62 = vsel %vm2089_vm0, %v634_v26, 0.0 }
 0x188   : > { %v1071_v13 = vmul.f32 %v1807_v6, %v1047_v60  ;;  %v692_v32 = vmul.f32 %v1723_v38, %v668_v62 }
 0x189   : > { %v1090_v61 = vpop.permute.xlu1 %1089  ;;  %v2187_v45 = vpop.permute.xlu0 %705 }
 0x18a   : > { %v1079_v53 = vadd.f32 %v1071_v13, %v998_v40  ;;  %v1035_v13 = vsel %vm2628_vm15, %v1009_v22, 0.0  ;;  %vm2706_vm15 = vcmp.lt.s32.totalorder %v2032_v59, 16 }
 0x18b   : > { %vm2236_vm2 = vmand %vm2130_vm5, %vm2706_vm15  ;;  %vm2709_vm15 = vcmask 1039360  }
 0x18d   : > { %v445_v20 = vpop.permute.xlu1 %444  ;;  %v2200_v52 = vpop.permute.xlu0 %921 }
 0x18e   : > { %v450_v15 = vsel %vm2700_vm13, %v2015_v23, %v445_v20  ;;  %vm2702_vm13 = vcmask 7168  }
 0x18f   : > { %v492_v33 = vsel %vm2038_vm3, %v450_v15, 0.0 }
 0x190   : > { %v520_v14 = vmul.f32 %v1834_v10, %v492_v33 }
 0x191   : > { %v544_v34 = vpop.permute.xlu1 %543  ;;  %v2211_v54 = vpop.permute.xlu0 %1010 }
 0x192   : > { %v549_v30 = vsel %vm2701_vm12, %v2030_v57, %v544_v34  ;;  %v803_v57 = vsel %vm1741_vm6, %v1789_v1, 0.0  ;;  %v1048_v1 = vsel %vm2130_vm5, %v1035_v13, 0.0  ;;  %vm2631_vm12 = vcmask 908288  }
 0x193   : > { %v581_v4 = vsel %vm2021_vm7, %v549_v30, 0.0  ;;  %v827_v40 = vmul.f32 %v1883_v21, %v803_v57  ;;  %v1072_v21 = vmul.f32 %v1807_v6, %v1048_v1  ;;  %v1104_v22 = vsel %vm2631_vm12, %v2006_v31, %v1090_v61 }
 0x194   : > { %v605_v51 = vmul.f32 %v1840_v11, %v581_v4  ;;  %v1116_v33 = vsel %vm2631_vm12, %v1090_v61, 0.0  ;;  %v2707_v34 = vmov 0 }
 0x195   : > { %v716_v23 = vpop.permute.xlu1 %715  ;;  %v621_v15 = vpop.permute.xlu0 %620  ;;  %v2708_v34 = vsel %vm2236_vm2, 4294967295, %v2707_v34  ;;  %v1129_v6 = vsel %vm2236_vm2, %v1116_v33, 0.0  ;;  %v1080_v4 = vadd.f32 %v1072_v21, %v999_v7  ;;  %vm2712_vm2 = vcmask 138240  }
 0x196   : > { %v613_v3 = vadd.f32 %v605_v51, %v520_v14  ;;  %v721_v56 = vsel %vm2702_vm13, %v2058_v25, %v716_v23  ;;  %vm2703_vm13 = vcmp.lt.s32.totalorder %v1928_v37, 16  ;;  %vm2714_vm5 = vmmov %vm2712_vm2 }
 0x197   : > { %v755_v26 = vsel %vm2078_vm10, %v721_v56, 0.0  ;;  %vm2224_vm8 = vmand %vm2121_vm1, %vm2703_vm13  ;;  %vm2710_vm13 = vcmask 130048  }
 0x198   : > { %v700_v36 = vadd.f32 %v692_v32, %v613_v3  ;;  %v779_v10 = vmul.f32 %v1871_v18, %v755_v26  ;;  %v2704_v18 = vmov 0  ;;  %v1128_v30 = vsel %vm2224_vm8, %v1104_v22, 0.0  ;;  %vm2711_vm12 = vmmov %vm2710_vm13 }
 0x199   : > { %v619_v11 = vpop.permute.xlu1 %618  ;;  %v2705_v18 = vsel %vm2224_vm8, 4294967295, %v2704_v18  ;;  %v559_v13 = vsel %vm2711_vm12, 0.0, %v534_v47  ;;  %v460_v22 = vsel %vm2712_vm2, 0.0, %v2176_v39  ;;  %vm2713_vm8 = vcmask 121856  }
 0x19a   : > { %v787_v38 = vadd.f32 %v779_v10, %v700_v36  ;;  %v644_v33 = vsel %vm2713_vm8, 0.0, %v619_v11  ;;  %vm2716_vm2 = vnez %v2668_v49 }
 0x19c   : > { %v835_v60 = vadd.f32 %v827_v40, %v787_v38 }
 0x19d   : > { %v2214_v25 = vpop.permute.xlu1 %840 }
 0x1a1   : > { %v2218_v20 = vpop.permute.xlu1 %1091 }
 0x1a5   : > { %v437_v37 = vpop.permute.xlu1 %436 }
 0x1a6   : > { %v1138_v62 = vpop.permute.xlu0 %1137 }
 0x1a7   : > { %v1152_v31 = vmul.f32 %v1138_v62, %v1128_v30  ;;  %v1153_v14 = vmul.f32 %v1138_v62, %v1129_v6  ;;  %v448_v30 = vsel %vm2714_vm5, %v2176_v39, %v437_v37  ;;  %v487_v39 = vsel %vm1944_vm14, %v460_v22, 0.0  ;;  %vm2715_vm5 = vmmov %vm2713_vm8 }
 0x1a8   : > { %v632_v37 = vsel %vm2715_vm5, %v619_v11, %v621_v15  ;;  %vm2717_vm8 = vcmask 7168   ;;  %v515_v11 = vmul.f32 %v1735_v41, %v487_v39  ;;  %vm2720_vm5 = vmmov %vm2709_vm15 }
 0x1a9   : > { %v1160_v61 = vadd.f32 %v1152_v31, %v1079_v53  ;;  %v1161_v51 = vadd.f32 %v1153_v14, %v1080_v4  ;;  %v536_v59 = vpop.permute.xlu1 %535  ;;  %v576_v14 = vsel %vm1932_vm9, %v559_v13, 0.0  ;;  %vm2718_vm12 = vmmov %vm2717_vm8  ;;  %v664_v13 = vsel %vm2089_vm0, %v632_v37, 0.0  ;;  %v2721_v37 = vld [vmem:[#allocation5_spill] sm:$0xff] }
 0x1aa   : > { %v924_v36 = vpop.permute.xlu0 %923  ;;  %v547_v40 = vsel %vm2710_vm13, %v534_v47, %v536_v59  ;;  %v663_v59 = vsel %vm2716_vm2, %v644_v33, 0.0  ;;  %vm2719_vm13 = vnez %v2670_v58 }
 0x1ab   : > { %v2245_v23 = vadd.f32 %v1825_v9, %v1160_v61  ;;  %v2248_v32 = vadd.f32 %v1825_v9, %v1161_v51  ;;  %v577_v4 = vsel %vm2021_vm7, %v547_v40, 0.0 }
 0x1ad   : > { %v2251_v3 = vmul.f32 0.70710677, %v2245_v23  ;;  %v2254_v56 = vmul.f32 0.70710677, %v2248_v32  ;;  %v851_v57 = vpop.permute.xlu1 %850  ;;  %v2435_v42 = vmul.f32 0.5, %v2248_v32 }
 0x1ae   : > { %v868_v7 = vsel %vm2709_vm15, %v851_v57, 0.0 }
 0x1af   : > { %v2258_v26 = vand.u32 2147483647, %v2251_v3  ;;  %v2261_v53 = vand.u32 2147483647, %v2254_v56  ;;  %v884_v9 = vsel %vm2115_vm11, %v868_v7, 0.0  ;;  %v601_v7 = vmul.f32 %v1753_v55, %v577_v4 }
 0x1b0   : > { %v908_v1 = vmul.f32 %v1867_v16, %v884_v9 }
 0x1b1   : > { %v1212_v10 = vmul.f32 0.3275911, %v2258_v26  ;;  %v849_v38 = vpop.permute.xlu1 %848  ;;  %v1213_v62 = vmul.f32 0.3275911, %v2261_v53 }
 0x1b2   : > { %v856_v21 = vsel %vm2709_vm15, %v849_v38, %v851_v57  ;;  %v2278_v31 = vadd.f32 %v908_v1, %v835_v60  ;;  %v488_v60 = vsel %vm2038_vm3, %v448_v30, 0.0  ;;  %v1013_v57 = vpop.permute.xlu0 %1012  ;;  %v731_v38 = vsel %vm2718_vm12, 0.0, %v2187_v45 }
 0x1b3   : > { %v1216_v6 = vadd.f32 1.0, %v1212_v10  ;;  %v883_v47 = vsel %vm2101_vm4, %v856_v21, 0.0  ;;  %v600_v10 = vmul.f32 %v1753_v55, %v576_v14  ;;  %v1217_v40 = vadd.f32 1.0, %v1213_v62 }
 0x1b4   : > { %v907_v61 = vmul.f32 %v1867_v16, %v883_v47  ;;  %v516_v15 = vmul.f32 %v1735_v41, %v488_v60  ;;  %v687_v1 = vmul.f32 %v1718_v35, %v663_v59  ;;  %v750_v41 = vsel %vm2719_vm13, %v731_v38, 0.0 }
 0x1b5   : > { %v708_v51 = vpop.permute.xlu1 %707  ;;  %1528 = vrcp.f32 %v1216_v6  ;;  %v608_v33 = vadd.f32 %v600_v10, %v515_v11  ;;  %v688_v30 = vmul.f32 %v1718_v35, %v664_v13  ;;  %v774_v14 = vmul.f32 %v1777_v63, %v750_v41  ;;  %v2725_v11 = vld [vmem:[#allocation10_spill] sm:$0xff] }
 0x1b6   : > { %v2294_v9 = vadd.f32 %v907_v61, %v2125_v19  ;;  %v719_v16 = vsel %vm2717_vm8, %v2187_v45, %v708_v51  ;;  %v609_v21 = vadd.f32 %v601_v7, %v516_v15  ;;  %1530 = vrcp.f32 %v1217_v40  ;;  %v2308_v55 = vpop.permute.xlu0 %1145  ;;  %v2723_v7 = vld [vmem:[#allocation4_spill] sm:$0xff] }
 0x1b7   : > { %v751_v19 = vsel %vm2078_vm10, %v719_v16, 0.0  ;;  %v695_v6 = vadd.f32 %v687_v1, %v608_v33  ;;  %v799_v61 = vsel %vm1741_vm6, %v1823_v8, 0.0  ;;  %vm2722_vm8 = vnez %v2645_v44 }
 0x1b8   : > { %v775_v45 = vmul.f32 %v1777_v63, %v751_v19  ;;  %v696_v4 = vadd.f32 %v688_v30, %v609_v21  ;;  %v798_v35 = vsel %vm2722_vm8, %v2721_v37, 0.0  ;;  %v823_v16 = vmul.f32 %v2723_v7, %v799_v61 }
 0x1b9   : > { %v843_v22 = vpop.permute.xlu1 %842  ;;  %vm2724_vm12 = vcmask 924672   ;;  %v822_v40 = vmul.f32 %v2723_v7, %v798_v35 }
 0x1ba   : > { %v854_v62 = vsel %vm2709_vm15, %v2214_v25, %v843_v22  ;;  %v866_v47 = vsel %vm2720_vm5, %v843_v22, 0.0  ;;  %v783_v39 = vadd.f32 %v775_v45, %v696_v4  ;;  %v782_v25 = vadd.f32 %v774_v14, %v695_v6  ;;  %v2328_v60 = vpop.permute.xlu0 %505  ;;  %vm2726_vm15 = vmmov %vm2724_vm12  ;;  %v2731_v4 = vld [vmem:[#allocation6_spill] sm:$0xff] }
 0x1bb   : > { %v879_v59 = vsel %vm2101_vm4, %v854_v62, 0.0  ;;  %v880_v63 = vsel %vm2115_vm11, %v866_v47, 0.0  ;;  %v935_v10 = vsel %vm2724_vm12, %v2200_v52, %v924_v36  ;;  %v947_v38 = vsel %vm2726_vm15, %v924_v36, 0.0 }
 0x1bc   : > { %v903_v15 = vmul.f32 %v2725_v11, %v879_v59  ;;  %v831_v13 = vadd.f32 %v823_v16, %v783_v39  ;;  %v904_v1 = vmul.f32 %v2725_v11, %v880_v63  ;;  %v830_v21 = vadd.f32 %v822_v40, %v782_v25  ;;  %v2733_v25 = vld [vmem:[#allocation16_spill] sm:$0xff] }
 0x1bd   : > { %vm2727_vm5 = vnez %v2696_v2  ;;  %vm2728_vm11 = vnez %v2699_v28  ;;  %vm2729_vm12 = vcmask 916480   ;;  %vm2736_vm4 = vnez %v2705_v18 }
 0x1be   : > { %v968_v22 = vsel %vm2727_vm5, %v935_v10, 0.0  ;;  %v969_v41 = vsel %vm2728_vm11, %v947_v38, 0.0  ;;  %v1024_v52 = vsel %vm2729_vm12, %v2211_v54, %v1013_v57  ;;  %v911_v30 = vadd.f32 %v903_v15, %v830_v21  ;;  %v2348_v45 = vpop.permute.xlu0 %931  ;;  %vm2730_vm15 = vmmov %vm2729_vm12 }
 0x1bf   : > { %v2321_v51 = vpop.eup %1528  ;;  %v1036_v36 = vsel %vm2730_vm15, %v1013_v57, 0.0  ;;  %v912_v6 = vadd.f32 %v904_v1, %v831_v13  ;;  %v992_v47 = vmul.f32 %v2731_v4, %v968_v22  ;;  %v993_v61 = vmul.f32 %v2731_v4, %v969_v41  ;;  %v2738_v22 = vld [vmem:[#allocation7_spill] sm:$0xff] }
 0x1c0   : > { %v1228_v8 = vmul.f32 1.0614054, %v2321_v51  ;;  %v2340_v19 = vpop.eup %1530  ;;  %v1049_v39 = vsel %vm2121_vm1, %v1024_v52, 0.0  ;;  %vm2732_vm12 = vnez %v2690_v0  ;;  %vm2734_vm15 = vcmask 908288  }
 0x1c1   : > { %v1229_v62 = vmul.f32 1.0614054, %v2340_v19  ;;  %v1050_v54 = vsel %vm2732_vm12, %v1036_v36, 0.0  ;;  %v1000_v35 = vadd.f32 %v992_v47, %v911_v30  ;;  %v1001_v59 = vadd.f32 %v993_v61, %v912_v6  ;;  %vm2735_vm1 = vmmov %vm2734_vm15  ;;  %v2739_v47 = vld [vmem:[#allocation2_spill] sm:$0xff] }
 0x1c2   : > { %v1232_v33 = vadd.f32 -1.4531521, %v1228_v8  ;;  %v1073_v63 = vmul.f32 %v2733_v25, %v1049_v39  ;;  %v2362_v7 = vpop.permute.xlu0 %929  ;;  %v1264_v8 = vsub.f32 0.0, %v2258_v26  ;;  %v1074_v10 = vmul.f32 %v2733_v25, %v1050_v54 }
 0x1c3   : > { %v1233_v57 = vadd.f32 -1.4531521, %v1229_v62  ;;  %vm2737_vm12 = vnez %v2708_v34 }
 0x1c4   : > { %v1236_v37 = vmul.f32 %v2321_v51, %v1232_v33  ;;  %v1081_v38 = vadd.f32 %v1073_v63, %v1000_v35  ;;  %v1082_v21 = vadd.f32 %v1074_v10, %v1001_v59  ;;  %v1268_v4 = vmul.f32 %v1264_v8, %v2258_v26 }
 0x1c5   : > { %v1237_v52 = vmul.f32 %v2340_v19, %v1233_v57  ;;  %v1265_v35 = vsub.f32 0.0, %v2261_v53 }
 0x1c6   : > { %v1240_v15 = vadd.f32 1.4214138, %v1236_v37  ;;  %v439_v62 = vpop.permute.xlu0 %438  ;;  %v1272_v63 = vmul.f32 1.442695, %v1268_v4 }
 0x1c7   : > { %v1241_v37 = vadd.f32 1.4214138, %v1237_v52 }
 0x1c8   : > { %v1244_v6 = vmul.f32 %v2321_v51, %v1240_v15  ;;  %1532 = vpow2.f32 %v1272_v63  ;;  %v2744_v63 = vld [vmem:[#allocation9_spill] sm:$0xff] }
 0x1c9   : > { %v1245_v8 = vmul.f32 %v2340_v19, %v1241_v37 }
 0x1ca   : > { %v2353_v14 = vpop.permute.xlu1 %1149  ;;  %v1248_v25 = vadd.f32 -0.28449672, %v1244_v6  ;;  %v538_v10 = vpop.permute.xlu0 %537 }
 0x1ce   : > { %v1094_v16 = vpop.permute.xlu1 %1093 }
 0x1cf   : > { %v1105_v40 = vsel %vm2734_vm15, %v2218_v20, %v1094_v16  ;;  %v1117_v11 = vsel %vm2735_vm1, %v1094_v16, 0.0  ;;  %vm2741_vm1 = vcmask 924672   ;;  %vm2742_vm15 = vcmask 130048  }
 0x1d0   : > { %v1130_v13 = vsel %vm2736_vm4, %v1105_v40, 0.0  ;;  %v1131_v1 = vsel %vm2737_vm12, %v1117_v11, 0.0  ;;  %v1269_v11 = vmul.f32 %v1265_v35, %v2261_v53  ;;  %v949_v53 = vsel %vm2741_vm1, %v2348_v45, 0.0 }
 0x1d1   : > { %v1154_v33 = vmul.f32 %v2738_v22, %v1130_v13  ;;  %v1155_v41 = vmul.f32 %v2738_v22, %v1131_v1  ;;  %v1252_v13 = vmul.f32 %v2321_v51, %v1248_v25  ;;  %v1249_v22 = vadd.f32 -0.28449672, %v1245_v8 }
 0x1d2   : > { %v2376_v30 = vpop.permute.xlu1 %622  ;;  %v801_v35 = vsel %vm1741_vm6, %v1898_v24, 0.0  ;;  %vm2743_vm12 = vcmask 138240   ;;  %v2428_v24 = vmul.f32 0.5, %v2245_v23  ;;  %vm2747_vm6 = vcmask 121856  }
 0x1d3   : > { %v1162_v20 = vadd.f32 %v1154_v33, %v1081_v38  ;;  %v1163_v36 = vadd.f32 %v1155_v41, %v1082_v21  ;;  %v1274_v41 = vmul.f32 1.442695, %v1269_v11  ;;  %v1256_v52 = vadd.f32 0.2548296, %v1252_v13 }
 0x1d4   : > { %v1253_v4 = vmul.f32 %v2340_v19, %v1249_v22  ;;  %v461_v25 = vsel %vm2743_vm12, 0.0, %v439_v62  ;;  %v973_v11 = vsel %vm2728_vm11, %v949_v53, 0.0  ;;  %v2425_v48 = vmul.f32 %v2744_v63, %v801_v35 }
 0x1d5   : > { %v2381_v61 = vadd.f32 %v2739_v47, %v1162_v20  ;;  %v2384_v39 = vadd.f32 %v2739_v47, %v1163_v36  ;;  %v2402_v20 = vpop.permute.xlu0 %844  ;;  %v2740_v36 = vld [vmem:[#allocation12_spill] sm:$0xff]  ;;  %v560_v47 = vsel %vm2742_vm15, 0.0, %v538_v10  ;;  %v1260_v44 = vmul.f32 %v2321_v51, %v1256_v52  ;;  %v1533_v52 = vpop.eup %1532 }
 0x1d6   : > { %v2386_v54 = vpop.permute.xlu1 %709  ;;  %v800_v6 = vsel %vm2722_vm8, %v2740_v36, 0.0  ;;  %vm2745_vm8 = vmmov %vm2742_vm15  ;;  %v2746_v36 = vld [vmem:[#allocation15_spill] sm:$0xff]  ;;  %vm2759_vm15 = vnez %v2690_v0 }
 0x1d7   : > { %v2390_v59 = vmul.f32 0.70710677, %v2381_v61  ;;  %v2393_v57 = vmul.f32 0.70710677, %v2384_v39  ;;  %v2416_v8 = vmul.f32 %v2744_v63, %v800_v6  ;;  %v645_v6 = vsel %vm2747_vm6, 0.0, %v2376_v30 }
 0x1d8   : > { %v2441_v23 = vmul.f32 %v1533_v52, %v1260_v44 }
 0x1d9   : > { %v1210_v26 = vand.u32 2147483647, %v2390_v59  ;;  %v1211_v16 = vand.u32 2147483647, %v2393_v57  ;;  %v625_v22 = vpop.permute.xlu0 %624 }
 0x1da   : > { %v2398_v40 = vpop.permute.xlu1 %925  ;;  %v1284_v49 = vsub.f32 1.0, %v2441_v23 }
 0x1db   : > { %v1214_v15 = vmul.f32 0.3275911, %v1210_v26  ;;  %v1215_v38 = vmul.f32 0.3275911, %v1211_v16  ;;  %v1267_v51 = vsub.f32 0.0, %v1211_v16 }
 0x1dd   : > { %v1218_v1 = vadd.f32 1.0, %v1214_v15  ;;  %v1219_v21 = vadd.f32 1.0, %v1215_v38  ;;  %v578_v15 = vsel %vm1932_vm9, %v560_v47, 0.0  ;;  %v1266_v38 = vsub.f32 0.0, %v1210_v26  ;;  %vm2748_vm9 = vmmov %vm2743_vm12 }
 0x1de   : > { %v441_v33 = vpop.permute.xlu1 %440  ;;  %vm2751_vm12 = vmmov %vm2747_vm6  ;;  %v1271_v44 = vmul.f32 %v1267_v51, %v1211_v16  ;;  %v2753_v51 = vld [vmem:[#allocation8_spill] sm:$0xff]  ;;  %vm2761_vm6 = vnez %v2685_v43 }
 0x1df   : > { %1534 = vrcp.f32 %v1218_v1  ;;  %v1257_v1 = vadd.f32 0.2548296, %v1253_v4  ;;  %v449_v53 = vsel %vm2748_vm9, %v439_v62, %v441_v33  ;;  %v2750_v4 = vld [vmem:[#allocation3_spill] sm:$0xff]  ;;  %v633_v63 = vsel %vm2751_vm12, %v2376_v30, %v625_v22 }
 0x1e0   : > { %1536 = vrcp.f32 %v1219_v21  ;;  %v489_v21 = vsel %vm1944_vm14, %v461_v25, 0.0  ;;  %vm2749_vm14 = vmmov %vm2741_vm1  ;;  %v602_v47 = vmul.f32 %v2750_v4, %v578_v15  ;;  %v1270_v25 = vmul.f32 %v1266_v38, %v1210_v26  ;;  %v1021_v38 = vpop.permute.xlu0 %1020 }
 0x1e1   : > { %1538 = vpow2.f32 %v1274_v41  ;;  %v937_v46 = vsel %vm2749_vm14, %v2362_v7, %v2348_v45  ;;  %v517_v35 = vmul.f32 %v2328_v60, %v489_v21  ;;  %v1261_v62 = vmul.f32 %v2340_v19, %v1257_v1  ;;  %vm2763_vm9 = vmmov %vm2749_vm14 }
 0x1e2   : > { %v540_v37 = vpop.permute.xlu1 %539  ;;  %v665_v45 = vsel %vm2716_vm2, %v645_v6, 0.0  ;;  %v490_v12 = vsel %vm2038_vm3, %v449_v53, 0.0  ;;  %v972_v26 = vsel %vm2727_vm5, %v937_v46, 0.0  ;;  %v666_v27 = vsel %vm2089_vm0, %v633_v63, 0.0  ;;  %vm2764_vm14 = vmmov %vm2763_vm9 }
 0x1e3   : > { %v548_v13 = vsel %vm2745_vm8, %v538_v10, %v540_v37  ;;  %v997_v10 = vmul.f32 %v2746_v36, %v973_v11  ;;  %v610_v15 = vadd.f32 %v602_v47, %v517_v35  ;;  %v1276_v21 = vmul.f32 1.442695, %v1270_v25 }
 0x1e4   : > { %v579_v37 = vsel %vm2021_vm7, %v548_v13, 0.0  ;;  %vm2752_vm7 = vcmask 7168   ;;  %v689_v22 = vmul.f32 %v2753_v51, %v665_v45  ;;  %v518_v52 = vmul.f32 %v2328_v60, %v490_v12  ;;  %v2756_v45 = vld [vmem:[#allocation11_spill] sm:$0xff] }
 0x1e5   : > { %v732_v30 = vsel %vm2752_vm7, 0.0, %v2386_v54  ;;  %v603_v19 = vmul.f32 %v2750_v4, %v579_v37  ;;  %vm1288_vm3 = vcmp.ge.f32.partialorder %v2251_v3, 0.0  ;;  %v1278_v53 = vmul.f32 1.442695, %v1271_v44  ;;  %vm2755_vm2 = vmmov %vm2752_vm7 }
 0x1e6   : > { %v2432_v41 = vpop.permute.xlu1 %1014  ;;  %v752_v46 = vsel %vm2719_vm13, %v732_v30, 0.0  ;;  %vm2754_vm0 = vcmask 916480   ;;  %v1292_v60 = vsub.f32 0.0, %v1284_v49  ;;  %v690_v63 = vmul.f32 %v2753_v51, %v666_v27 }
 0x1e7   : > { %v1038_v47 = vsel %vm2754_vm0, %v1021_v38, 0.0  ;;  %v611_v37 = vadd.f32 %v603_v19, %v518_v52  ;;  %1540 = vpow2.f32 %v1276_v21  ;;  %v697_v30 = vadd.f32 %v689_v22, %v610_v15  ;;  %v1019_v19 = vpop.permute.xlu0 %1018  ;;  %vm2765_vm12 = vmmov %vm2754_vm0 }
 0x1e8   : > { %1542 = vpow2.f32 %v1278_v53  ;;  %vm2757_vm13 = vcmask 1039360   ;;  %v2495_v51 = vadd.f32 %v997_v10, %v2278_v31  ;;  %v1054_v15 = vsel %vm2759_vm15, %v1038_v47, 0.0  ;;  %v2762_v47 = vld [vmem:[#allocation18_spill] sm:$0xff] }
 0x1e9   : > { %v2449_v32 = vpop.eup %1534  ;;  %vm2758_vm1 = vmmov %vm2757_vm13  ;;  %v2500_v52 = vmul.f32 %v2746_v36, %v972_v26  ;;  %vm2760_vm8 = vnez %v2682_v5  ;;  %v1296_v10 = vsel %vm1288_vm3, %v1284_v49, %v1292_v60  ;;  %v1026_v3 = vsel %vm2765_vm12, %v1019_v19, %v1021_v38  ;;  %v2766_v60 = vld [vmem:[#allocation13_spill] sm:$0xff] }
 0x1ea   : > { %v2455_v33 = vpop.eup %1536  ;;  %v2461_v7 = vpop.permute.xlu1 %1184  ;;  %v1230_v11 = vmul.f32 1.0614054, %v2449_v32  ;;  %vm2770_vm7 = vnez %v2687_v50  ;;  %vm2772_vm3 = vcmask 908288  }
 0x1eb   : > { %v1231_v16 = vmul.f32 1.0614054, %v2455_v33  ;;  %v1539_v1 = vpop.eup %1538 }
 0x1ec   : > { %v1234_v13 = vadd.f32 -1.4531521, %v1230_v11  ;;  %v1281_v4 = vmul.f32 %v1539_v1, %v1261_v62  ;;  %v776_v62 = vmul.f32 %v2756_v45, %v752_v46  ;;  %v698_v1 = vadd.f32 %v690_v63, %v611_v37 }
 0x1ed   : > { %v1235_v6 = vadd.f32 -1.4531521, %v1231_v16  ;;  %v1078_v37 = vmul.f32 %v2762_v47, %v1054_v15  ;;  %v1300_v15 = vadd.f32 1.0, %v1296_v10 }
 0x1ee   : > { %v712_v23 = vpop.permute.xlu1 %711  ;;  %v1238_v17 = vmul.f32 %v2449_v32, %v1234_v13 }
 0x1ef   : > { %v720_v35 = vsel %vm2755_vm2, %v2386_v54, %v712_v23  ;;  %v1239_v25 = vmul.f32 %v2455_v33, %v1235_v6  ;;  %v1285_v54 = vsub.f32 1.0, %v1281_v4  ;;  %v784_v6 = vadd.f32 %v776_v62, %v697_v30 }
 0x1f0   : > { %v753_v44 = vsel %vm2078_vm10, %v720_v35, 0.0  ;;  %v1242_v58 = vadd.f32 1.4214138, %v1238_v17  ;;  %vm1289_vm10 = vcmp.ge.f32.partialorder %v2254_v56, 0.0  ;;  %v2513_v35 = vpop.permute.xlu0 %1189  ;;  %vm2774_vm2 = vnez %v2708_v34 }
 0x1f1   : > { %v777_v12 = vmul.f32 %v2756_v45, %v753_v44  ;;  %v1243_v11 = vadd.f32 1.4214138, %v1239_v25  ;;  %v1293_v17 = vsub.f32 0.0, %v1285_v54 }
 0x1f2   : > { %v847_v16 = vpop.permute.xlu1 %846  ;;  %v1246_v13 = vmul.f32 %v2449_v32, %v1242_v58  ;;  %v832_v58 = vadd.f32 %v2416_v8, %v784_v6 }
 0x1f3   : > { %v855_v27 = vsel %vm2757_vm13, %v2402_v20, %v847_v16  ;;  %v867_v29 = vsel %vm2758_vm1, %v847_v16, 0.0  ;;  %v1247_v21 = vmul.f32 %v2455_v33, %v1243_v11  ;;  %v785_v53 = vadd.f32 %v777_v12, %v698_v1  ;;  %v1541_v12 = vpop.eup %1540  ;;  %v2767_v11 = vld [vmem:[#allocation14_spill] sm:$0xff] }
 0x1f4   : > { %v1250_v22 = vadd.f32 -0.28449672, %v1246_v13  ;;  %v881_v20 = vsel %vm2760_vm8, %v855_v27, 0.0  ;;  %v882_v23 = vsel %vm2761_vm6, %v867_v29, 0.0  ;;  %v1297_v2 = vsel %vm1289_vm10, %v1285_v54, %v1293_v17  ;;  %v1543_v16 = vpop.eup %1542  ;;  %v2771_v27 = vld [vmem:[#allocation17_spill] sm:$0xff] }
 0x1f5   : > { %v1251_v46 = vadd.f32 -0.28449672, %v1247_v21  ;;  %v833_v49 = vadd.f32 %v2425_v48, %v785_v53  ;;  %v905_v44 = vmul.f32 %v2766_v60, %v881_v20  ;;  %v1301_v10 = vadd.f32 1.0, %v1297_v2 }
 0x1f6   : > { %v928_v4 = vpop.permute.xlu1 %927  ;;  %v1254_v31 = vmul.f32 %v2449_v32, %v1250_v22  ;;  %v1096_v22 = vpop.permute.xlu0 %1095  ;;  %vm1290_vm13 = vcmp.ge.f32.partialorder %v2390_v59, 0.0  ;;  %vm1291_vm1 = vcmp.ge.f32.partialorder %v2393_v57, 0.0  ;;  %v1202_v59 = vmul.f32 0.5, %v2381_v61 }
 0x1f7   : > { %v936_v36 = vsel %vm2763_vm9, %v2398_v40, %v928_v4  ;;  %v948_v26 = vsel %vm2764_vm14, %v928_v4, 0.0  ;;  %v1255_v25 = vmul.f32 %v2455_v33, %v1251_v46  ;;  %v906_v40 = vmul.f32 %v2766_v60, %v882_v23 }
 0x1f8   : > { %v970_v5 = vsel %vm2727_vm5, %v936_v36, 0.0  ;;  %v971_v43 = vsel %vm2728_vm11, %v948_v26, 0.0  ;;  %v1258_v63 = vadd.f32 0.2548296, %v1254_v31  ;;  %vm2768_vm11 = vmmov %vm2754_vm0  ;;  %v913_v13 = vadd.f32 %v905_v44, %v832_v58 }
 0x1f9   : > { %v1259_v62 = vadd.f32 0.2548296, %v1255_v25  ;;  %v994_v30 = vmul.f32 %v2767_v11, %v970_v5  ;;  %v995_v38 = vmul.f32 %v2767_v11, %v971_v43  ;;  %vm2769_vm5 = vmmov %vm2754_vm0  ;;  %v914_v1 = vadd.f32 %v906_v40, %v833_v49 }
 0x1fa   : > { %v1017_v45 = vpop.permute.xlu1 %1016  ;;  %v1262_v28 = vmul.f32 %v2449_v32, %v1258_v63  ;;  %vm2773_vm0 = vmmov %vm2772_vm3 }
 0x1fb   : > { %v1025_v48 = vsel %vm2768_vm11, %v2432_v41, %v1017_v45  ;;  %v1037_v19 = vsel %vm2769_vm5, %v1017_v45, 0.0  ;;  %v1263_v54 = vmul.f32 %v2455_v33, %v1259_v62  ;;  %v1053_v41 = vsel %vm2770_vm7, %v1026_v3, 0.0  ;;  %vm2775_vm10 = vmmov %vm2773_vm0 }
 0x1fc   : > { %v1051_v8 = vsel %vm2770_vm7, %v1025_v48, 0.0  ;;  %v1052_v56 = vsel %vm2759_vm15, %v1037_v19, 0.0  ;;  %v1282_v32 = vmul.f32 %v1541_v12, %v1262_v28  ;;  %v1002_v20 = vadd.f32 %v994_v30, %v913_v13  ;;  %vm2776_vm15 = vmmov %vm2773_vm0  ;;  %v1312_v13 = vld [vmem:[%s2591_s5] sm:$0xff] }
 0x1fd   : > { %v1075_v29 = vmul.f32 %v2771_v27, %v1051_v8  ;;  %v1076_v21 = vmul.f32 %v2771_v27, %v1052_v56  ;;  %v1283_v53 = vmul.f32 %v1543_v16, %v1263_v54  ;;  %v1003_v0 = vadd.f32 %v995_v38, %v914_v1 }
 0x1fe   : > { %v1098_v6 = vpop.permute.xlu1 %1097  ;;  %v1286_v46 = vsub.f32 1.0, %v1282_v32  ;;  %v1086_v3 = vadd.f32 %v1078_v37, %v2495_v51  ;;  %v1077_v40 = vmul.f32 %v2762_v47, %v1053_v41  ;;  %v1304_v51 = vmul.f32 %v1300_v15, %v2428_v24 }
 0x1ff   : > { %v1106_v23 = vsel %vm2772_vm3, %v1096_v22, %v1098_v6  ;;  %v1118_v33 = vsel %vm2773_vm0, %v1098_v6, 0.0  ;;  %v1287_v31 = vsub.f32 1.0, %v1283_v53  ;;  %v1083_v50 = vadd.f32 %v1075_v29, %v1002_v20 }
 0x200   : > { %v1132_v4 = vsel %vm2736_vm4, %v1106_v23, 0.0  ;;  %v1133_v17 = vsel %vm2774_vm2, %v1118_v33, 0.0  ;;  %v1084_v36 = vadd.f32 %v1076_v21, %v1003_v0  ;;  %v1294_v63 = vsub.f32 0.0, %v1286_v46 }
 0x201   : > { %v1156_v26 = vmul.f32 %v2308_v55, %v1132_v4  ;;  %v1157_v5 = vmul.f32 %v2308_v55, %v1133_v17  ;;  %v1295_v25 = vsub.f32 0.0, %v1287_v31  ;;  %v1305_v55 = vmul.f32 %v1301_v10, %v2435_v42 }
 0x202   : > { %v1102_v43 = vpop.permute.xlu1 %1101  ;;  %v1004_v37 = vadd.f32 %v2500_v52, %v2294_v9  ;;  %v1298_v34 = vsel %vm1290_vm13, %v1286_v46, %v1294_v63  ;;  %v1203_v47 = vmul.f32 0.5, %v2384_v39 }
 0x203   : > { %v1164_v49 = vadd.f32 %v1156_v26, %v1083_v50  ;;  %v1165_v60 = vadd.f32 %v1157_v5, %v1084_v36  ;;  %v1119_v44 = vsel %vm2775_vm10, %v1102_v43, 0.0  ;;  %v1299_v45 = vsel %vm1291_vm1, %v1287_v31, %v1295_v25 }
 0x204   : > { %v1135_v58 = vsel %vm2774_vm2, %v1119_v44, 0.0  ;;  %v1303_v28 = vadd.f32 1.0, %v1299_v45  ;;  %v1085_v38 = vadd.f32 %v1077_v40, %v1004_v37  ;;  %v1302_v52 = vadd.f32 1.0, %v1298_v34 }
 0x205   : > { %v1196_v62 = vadd.f32 %v2461_v7, %v1164_v49  ;;  %v1197_v57 = vadd.f32 %v2461_v7, %v1165_v60  ;;  %v1159_v2 = vmul.f32 %v2353_v14, %v1135_v58 }
 0x206   : > { %v1100_v12 = vpop.permute.xlu1 %1099  ;;  %v1307_v9 = vmul.f32 %v1303_v28, %v1203_v47  ;;  %v1306_v54 = vmul.f32 %v1302_v52, %v1202_v59 }
 0x207   : > { %v1167_v11 = vadd.f32 %v1159_v2, %v1086_v3  ;;  %v1107_v42 = vsel %vm2776_vm15, %v1100_v12, %v1102_v43  ;;  %v1309_v30 = vmul.f32 %v1305_v55, %v1197_v57  ;;  %v1308_v48 = vmul.f32 %v1304_v51, %v1196_v62 }
 0x208   : > { %v1134_v7 = vsel %vm2736_vm4, %v1107_v42, 0.0  ;;  %vm2777_vm4 = vcmask 130048  }
 0x209   : > { %v1199_v24 = vadd.f32 %v2513_v35, %v1167_v11  ;;  %v1158_v19 = vmul.f32 %v2353_v14, %v1134_v7  ;;  %v1317_v14 = vpop.permute.xlu0 %1316 }
 0x20b   : > { %v1166_v16 = vadd.f32 %v1158_v19, %v1085_v38  ;;  %v1311_v39 = vmul.f32 %v1307_v9, %v1199_v24 }
 0x20d   : > { %v1198_v8 = vadd.f32 %v2513_v35, %v1166_v16  ;;  %v1468_v56 = vpack.c.bf16 %v1311_v39, %v1309_v30 }
 0x20f   : > { %1469 = vmatprep.subr.bf16.mxu1 %v1468_v56  ;;  %v1310_v32 = vmul.f32 %v1306_v54, %v1198_v8 }
 0x211   : > { %v1470_v18 = vpack.c.bf16 %v1310_v32, %v1308_v48 }
 0x213   : > { %1471 = vmatpush1.bf16.msra.mxu1 %v1470_v18 }
 0x216   : > { %1463 = vmatmul.mubr.msk.f32.vlgmr.msra.gmra.mrb[2].mxu1 %vm2777_vm4, %v1312_v13 }
 0x2e9   : > { %v1388_v61 = vpop.f32.mrb[2].mxu1 }
 0x2ea   : > { %v1389_v35 = vadd.f32 %v1388_v61, %v1317_v14  ;;  %v1390_v1 = vpop.f32.mrb[3].mxu1 }
 0x2eb   : > { %v1391_v27 = vadd.f32 %v1390_v1, %v1317_v14 }
 0x2ec   : > { %1393 = vst [vmem:[%s278_s13] sm:$0xff] %v1389_v35 }
 0x2ed   : > { %1394 = vst [vmem:[%s278_s13 + $0x8] sm:$0xff] %v1391_v27 }
 0x2ee PF: > { %s17_s24 = sadd.s32 1, %s1550_s24  }
 0x2ef   : > { %p14_p4 = scmp.ge.s32.totalorder %s17_s24, 4  }
 0x2f1   :  { %16 = sbr.rel (!%p14_p4) target bundleno = 1 (0x1), region = 78 }

</bundles_post_ra>
